<compile_context>
chip_gen: v5e
topology: v5e:2x2
jax: 0.10.0
libtpu: 0.0.40
codegen_flags: <defaults>
</compile_context>

<pallas_src>
import jax
import jax.numpy as jnp
from jax.experimental import pallas as pl
from jax.experimental.pallas import tpu as pltpu


def _make_kernel(tau, n_layers, batch, d_model, num_targets):
    H = d_model
    L = n_layers
    B = batch
    T = num_targets

    def kernel(*refs):
        emb_ref, h0_ref, c0_ref = refs[:3]
        idx = 3
        wih_refs, whh_refs = [], []
        for _ in range(L):
            wih_refs.append(refs[idx])
            whh_refs.append(refs[idx + 1])
            idx += 2
        bias_refs = refs[idx:idx + (L - 1)]
        idx += (L - 1)
        w12_ref, b12_ref = refs[idx], refs[idx + 1]
        heads_ref = refs[idx + 2]                      # (tau*B, 2T) output

        bf16 = jnp.bfloat16

        def lstm_cell(gates, c_prev):
            # 4H == 128 -> gates is exactly one f32 vreg; full-block sigmoid /
            # tanh costs the same as sliced (2 EUP pushes).  If H grows so
            # gates spans several lane-vregs, revert to per-gate slicing.
            sig = jax.nn.sigmoid(gates)
            th = jnp.tanh(gates)
            i = sig[:, 0 * H:1 * H]
            f = sig[:, 1 * H:2 * H]
            g = th[:, 2 * H:3 * H]
            o = sig[:, 3 * H:4 * H]
            c_new = f * c_prev + i * g
            h_new = o * jnp.tanh(c_new)
            return h_new, c_new

        # Load weights / pre-broadcast biases once, outside the unrolled loop.
        w_ih = [r[...] for r in wih_refs]              # (H, 4H) bf16 each
        w_hh = [r[...] for r in whh_refs]              # (H, 4H) bf16 each
        biases = [r[...] for r in bias_refs]           # (B, 4H) f32, layers 1..L-1

        hs = [h0_ref[l] for l in range(L)]             # (B, H) f32 each
        cs = [c0_ref[l] for l in range(L)]

        # "Ready-ahead" recurrent half of the gates:
        #   rec[l] = h_l(t-1) @ W_hh_l  (+ b_l for l>=1; layer-0 bias is folded
        #   into emb_proj in the wrapper).
        rec = []
        for l in range(L):
            r = jnp.dot(hs[l].astype(bf16), w_hh[l],
                        preferred_element_type=jnp.float32)
            if l >= 1:
                r = r + biases[l - 1]
            rec.append(r)

        hid_steps = []

        # ---- time loop, fully unrolled (tau is static) ----
        for t in range(tau):
            last_step = (t == tau - 1)

            # Layer 0: late operand is h_top(t-1); recurrent half + emb part
            # are already available.
            gates = (jnp.dot(hs[L - 1].astype(bf16), w_ih[0],
                             preferred_element_type=jnp.float32)
                     + rec[0] + emb_ref[t])
            h_new, c_new = lstm_cell(gates, cs[0])
            hs[0], cs[0] = h_new, c_new
            if not last_step:
                # Eagerly issue next step's recurrent half (off the serial chain).
                rec[0] = jnp.dot(h_new.astype(bf16), w_hh[0],
                                 preferred_element_type=jnp.float32)
            x = h_new

            for l in range(1, L):
                gates = (jnp.dot(x.astype(bf16), w_ih[l],
                                 preferred_element_type=jnp.float32)
                         + rec[l])
                h_new, c_new = lstm_cell(gates, cs[l])
                hs[l], cs[l] = h_new, c_new
                if not last_step:
                    rec[l] = (jnp.dot(h_new.astype(bf16), w_hh[l],
                                      preferred_element_type=jnp.float32)
                              + biases[l - 1])
                x = h_new

            # Keep the top-layer hidden of this step in vregs (no VMEM stash).
            hid_steps.append(x)

        # ---- output heads: one batched matmul over all tau*B rows ----
        hid = jnp.concatenate(hid_steps, axis=0)                 # (tau*B, H)
        heads = (jnp.dot(hid.astype(bf16), w12_ref[...],
                         preferred_element_type=jnp.float32)
                 + b12_ref[...])                                 # (tau*B, 2T)
        # Stable softplus on the sigma lanes only, selected with a lane mask
        # (no lane-offset slicing -> no XLU realign, single lane-dense store).
        lane = jax.lax.broadcasted_iota(jnp.int32, heads.shape, 1)
        sp = jnp.maximum(heads, 0.0) + jnp.log(1.0 + jnp.exp(-jnp.abs(heads)))
        heads_ref[...] = jnp.where(lane >= T, sp, heads)

    return kernel


def pack_decoder_weights(params, batch):
    """One-time weight packing (bf16 casts, splits, bias broadcasts).

    Keep the result and reuse it across calls so the per-call hot path only
    contains the embedding gather, emb_proj and the kernel itself.
    """
    H = params["w_hh"][0].shape[0]
    L = len(params["w_ih"])
    wih0 = params["w_ih"][0]                            # (H + E, 4H)
    packed = dict(
        emb_tables=list(params["emb_tables"]),
        w_ih0_emb=wih0[H:],                             # (E, 4H) f32 — hoisted proj
        b0=params["b"][0],                              # (1, 4H) f32 — folded into emb_proj
        w_ih=[wih0[:H].astype(jnp.bfloat16)] +
             [params["w_ih"][l].astype(jnp.bfloat16) for l in range(1, L)],
        w_hh=[params["w_hh"][l].astype(jnp.bfloat16) for l in range(L)],
        b_bcast=[jnp.broadcast_to(params["b"][l], (batch, 4 * H)).astype(jnp.float32)
                 for l in range(1, L)],
        w12=jnp.concatenate([params["w1"], params["w2"]], axis=1).astype(jnp.bfloat16),
        b12=jnp.concatenate([params["b1"], params["b2"]], axis=1).astype(jnp.float32),
    )
    return packed


def lstm_decoder_pallas(future, hidden, cell, packed):
    """future: (B, tau, n_cat) int32; hidden/cell: (n_layers, B, d_model) f32."""
    B, tau, n_cat = future.shape
    L, _, H = hidden.shape
    T = packed["w12"].shape[1] // 2

    # --- glue (plain JAX): embedding gather + flatten, matching
    #   cat([Emb_i(future[:,:,i:i+1])], -2).view(B, tau, -1)
    emb = jnp.concatenate(
        [jnp.take(packed["emb_tables"][i], future[:, :, i], axis=0)
         for i in range(n_cat)],
        axis=-1,
    )                                        # (B, tau, E)
    emb_tm = jnp.transpose(emb, (1, 0, 2))   # (tau, B, E) time-major

    # --- hoisted non-recurrent input projection, layer-0 bias folded in ---
    emb_proj = (jnp.einsum("tbe,eg->tbg", emb_tm, packed["w_ih0_emb"],
                           precision=jax.lax.Precision.HIGHEST)
                + packed["b0"]).astype(jnp.float32)            # (tau, B, 4H)

    inputs = [emb_proj, hidden, cell]
    for l in range(L):
        inputs += [packed["w_ih"][l], packed["w_hh"][l]]
    inputs += list(packed["b_bcast"])
    inputs += [packed["w12"], packed["b12"]]

    vmem = pl.BlockSpec(memory_space=pltpu.MemorySpace.VMEM)
    heads_flat = pl.pallas_call(
        _make_kernel(tau, L, B, H, T),
        out_shape=jax.ShapeDtypeStruct((tau * B, 2 * T), jnp.float32),
        in_specs=[vmem] * len(inputs),
        out_specs=vmem,
    )(*inputs)

    heads = jnp.transpose(heads_flat.reshape(tau, B, 2 * T), (1, 0, 2))  # (B,tau,2T)
    return heads[..., :T], heads[..., T:]


def lstm_decoder_reference(future, hidden, cell, params):
    """Pure-JAX reference mirroring the PyTorch forward exactly."""
    emb_tables = params["emb_tables"]
    B, tau, n_cat = future.shape
    L, _, H = hidden.shape
    hp = jax.lax.Precision.HIGHEST

    emb = jnp.concatenate(
        [jnp.take(emb_tables[i], future[:, :, i], axis=0) for i in range(n_cat)],
        axis=-1,
    )  # (B, tau, E)

    h, c = hidden, cell
    outs = []
    for t in range(tau):
        x = jnp.concatenate([h[L - 1], emb[:, t, :]], axis=-1)
        new_h, new_c = [], []
        for l in range(L):
            gates = (jnp.dot(x, params["w_ih"][l], precision=hp)
                     + jnp.dot(h[l], params["w_hh"][l], precision=hp)
                     + params["b"][l])
            i = jax.nn.sigmoid(gates[:, 0 * H:1 * H])
            f = jax.nn.sigmoid(gates[:, 1 * H:2 * H])
            g = jnp.tanh(gates[:, 2 * H:3 * H])
            o = jax.nn.sigmoid(gates[:, 3 * H:4 * H])
            c_l = f * c[l] + i * g
            h_l = o * jnp.tanh(c_l)
            new_h.append(h_l)
            new_c.append(c_l)
            x = h_l
        h, c = jnp.stack(new_h), jnp.stack(new_c)
        outs.append(x)
    out = jnp.stack(outs, axis=1)  # (B, tau, H)
    mu = jnp.dot(out, params["w1"], precision=hp) + params["b1"]
    sigma = jnp.log(1.0 + jnp.exp(jnp.dot(out, params["w2"], precision=hp)
                                  + params["b2"]))
    return mu, sigma


if __name__ == "__main__":
    # Module hyper-parameters (d_input must equal d_model for this forward).
    B, tau = 8, 6
    d_model = 32
    d_embedding = 8
    n_embedding = [5, 7, 11]
    num_targets = 2
    n_layers = 3
    H = d_model
    E = len(n_embedding) * d_embedding

    key = jax.random.PRNGKey(0)
    keys = iter(jax.random.split(key, 40))

    emb_tables = [jax.random.normal(next(keys), (n, d_embedding), jnp.float32) * 0.1
                  for n in n_embedding]

    scale = 1.0 / float(jnp.sqrt(H))
    w_ih, w_hh, b = [], [], []
    for l in range(n_layers):
        in_l = (H + E) if l == 0 else H
        w_ih.append(jax.random.uniform(next(keys), (in_l, 4 * H), jnp.float32,
                                       -scale, scale))
        w_hh.append(jax.random.uniform(next(keys), (H, 4 * H), jnp.float32,
                                       -scale, scale))
        b_ih = jax.random.uniform(next(keys), (1, 4 * H), jnp.float32, -scale, scale)
        b_hh = jax.random.uniform(next(keys), (1, 4 * H), jnp.float32, -scale, scale)
        b.append(b_ih + b_hh)

    w1 = jax.random.uniform(next(keys), (H, num_targets), jnp.float32, -scale, scale)
    b1 = jax.random.uniform(next(keys), (1, num_targets), jnp.float32, -scale, scale)
    w2 = jax.random.uniform(next(keys), (H, num_targets), jnp.float32, -scale, scale)
    b2 = jax.random.uniform(next(keys), (1, num_targets), jnp.float32, -scale, scale)

    params = dict(emb_tables=emb_tables, w_ih=w_ih, w_hh=w_hh, b=b,
                  w1=w1, b1=b1, w2=w2, b2=b2)

    # Inputs: categorical future covariates + encoder hidden/cell state.
    cols = [jax.random.randint(next(keys), (B, tau, 1), 0, n) for n in n_embedding]
    future = jnp.concatenate(cols, axis=-1).astype(jnp.int32)       # (B, tau, 3)
    hidden = jax.random.normal(next(keys), (n_layers, B, H), jnp.float32) * 0.1
    cell = jax.random.normal(next(keys), (n_layers, B, H), jnp.float32) * 0.1

    # One-time weight packing (out of the hot path); jit the per-call wrapper.
    packed = jax.tree_util.tree_map(jnp.asarray, pack_decoder_weights(params, B))
    decoder = jax.jit(lstm_decoder_pallas)

    mu, sigma = decoder(future, hidden, cell, packed)
    jax.block_until_ready((mu, sigma))

    mu_ref, sigma_ref = lstm_decoder_reference(future, hidden, cell, params)
    assert mu.shape == (B, tau, num_targets) and sigma.shape == (B, tau, num_targets)
    assert bool(jnp.all(jnp.isfinite(mu))) and bool(jnp.all(jnp.isfinite(sigma)))
    assert bool(jnp.allclose(mu, mu_ref, rtol=5e-2, atol=5e-2))
    assert bool(jnp.allclose(sigma, sigma_ref, rtol=5e-2, atol=5e-2))

    print("KERNEL_OK")
</pallas_src>

<mosaic_0001>
module attributes {stable_mosaic.version = 11 : i64} {
  func.func @kernel(%arg0: memref<6x8x128xf32, #tpu.memory_space<vmem>>, %arg1: memref<3x8x32xf32, #tpu.memory_space<vmem>>, %arg2: memref<3x8x32xf32, #tpu.memory_space<vmem>>, %arg3: memref<32x128xbf16, #tpu.memory_space<vmem>>, %arg4: memref<32x128xbf16, #tpu.memory_space<vmem>>, %arg5: memref<32x128xbf16, #tpu.memory_space<vmem>>, %arg6: memref<32x128xbf16, #tpu.memory_space<vmem>>, %arg7: memref<32x128xbf16, #tpu.memory_space<vmem>>, %arg8: memref<32x128xbf16, #tpu.memory_space<vmem>>, %arg9: memref<8x128xf32, #tpu.memory_space<vmem>>, %arg10: memref<8x128xf32, #tpu.memory_space<vmem>>, %arg11: memref<32x4xbf16, #tpu.memory_space<vmem>>, %arg12: memref<1x4xf32, #tpu.memory_space<vmem>>, %arg13: memref<48x4xf32, #tpu.memory_space<vmem>>) attributes {dimension_semantics = [], scalar_prefetch = 0 : i64, scratch_operands = 0 : i64, tpu.core_type = #tpu.core_type<tc>} {
    %c0 = arith.constant 0 : index
    %c0_0 = arith.constant 0 : index
    %0 = vector.load %arg3[%c0, %c0_0] : memref<32x128xbf16, #tpu.memory_space<vmem>>, vector<32x128xbf16>
    %c0_1 = arith.constant 0 : index
    %c0_2 = arith.constant 0 : index
    %1 = vector.load %arg5[%c0_1, %c0_2] : memref<32x128xbf16, #tpu.memory_space<vmem>>, vector<32x128xbf16>
    %c0_3 = arith.constant 0 : index
    %c0_4 = arith.constant 0 : index
    %2 = vector.load %arg7[%c0_3, %c0_4] : memref<32x128xbf16, #tpu.memory_space<vmem>>, vector<32x128xbf16>
    %c0_5 = arith.constant 0 : index
    %c0_6 = arith.constant 0 : index
    %3 = vector.load %arg4[%c0_5, %c0_6] : memref<32x128xbf16, #tpu.memory_space<vmem>>, vector<32x128xbf16>
    %c0_7 = arith.constant 0 : index
    %c0_8 = arith.constant 0 : index
    %4 = vector.load %arg6[%c0_7, %c0_8] : memref<32x128xbf16, #tpu.memory_space<vmem>>, vector<32x128xbf16>
    %c0_9 = arith.constant 0 : index
    %c0_10 = arith.constant 0 : index
    %5 = vector.load %arg8[%c0_9, %c0_10] : memref<32x128xbf16, #tpu.memory_space<vmem>>, vector<32x128xbf16>
    %c0_11 = arith.constant 0 : index
    %c0_12 = arith.constant 0 : index
    %6 = vector.load %arg9[%c0_11, %c0_12] : memref<8x128xf32, #tpu.memory_space<vmem>>, vector<8x128xf32>
    %c0_13 = arith.constant 0 : index
    %c0_14 = arith.constant 0 : index
    %7 = vector.load %arg10[%c0_13, %c0_14] : memref<8x128xf32, #tpu.memory_space<vmem>>, vector<8x128xf32>
    %c0_15 = arith.constant 0 : index
    %c0_16 = arith.constant 0 : index
    %c0_17 = arith.constant 0 : index
    %8 = vector.load %arg1[%c0_15, %c0_16, %c0_17] : memref<3x8x32xf32, #tpu.memory_space<vmem>>, vector<1x8x32xf32>
    %9 = vector.shape_cast %8 : vector<1x8x32xf32> to vector<8x32xf32>
    %c1 = arith.constant 1 : index
    %c0_18 = arith.constant 0 : index
    %c0_19 = arith.constant 0 : index
    %10 = vector.load %arg1[%c1, %c0_18, %c0_19] : memref<3x8x32xf32, #tpu.memory_space<vmem>>, vector<1x8x32xf32>
    %11 = vector.shape_cast %10 : vector<1x8x32xf32> to vector<8x32xf32>
    %c2 = arith.constant 2 : index
    %c0_20 = arith.constant 0 : index
    %c0_21 = arith.constant 0 : index
    %12 = vector.load %arg1[%c2, %c0_20, %c0_21] : memref<3x8x32xf32, #tpu.memory_space<vmem>>, vector<1x8x32xf32>
    %13 = vector.shape_cast %12 : vector<1x8x32xf32> to vector<8x32xf32>
    %c0_22 = arith.constant 0 : index
    %c0_23 = arith.constant 0 : index
    %c0_24 = arith.constant 0 : index
    %14 = vector.load %arg2[%c0_22, %c0_23, %c0_24] : memref<3x8x32xf32, #tpu.memory_space<vmem>>, vector<1x8x32xf32>
    %15 = vector.shape_cast %14 : vector<1x8x32xf32> to vector<8x32xf32>
    %c1_25 = arith.constant 1 : index
    %c0_26 = arith.constant 0 : index
    %c0_27 = arith.constant 0 : index
    %16 = vector.load %arg2[%c1_25, %c0_26, %c0_27] : memref<3x8x32xf32, #tpu.memory_space<vmem>>, vector<1x8x32xf32>
    %17 = vector.shape_cast %16 : vector<1x8x32xf32> to vector<8x32xf32>
    %c2_28 = arith.constant 2 : index
    %c0_29 = arith.constant 0 : index
    %c0_30 = arith.constant 0 : index
    %18 = vector.load %arg2[%c2_28, %c0_29, %c0_30] : memref<3x8x32xf32, #tpu.memory_space<vmem>>, vector<1x8x32xf32>
    %19 = vector.shape_cast %18 : vector<1x8x32xf32> to vector<8x32xf32>
    %20 = arith.truncf %9 : vector<8x32xf32> to vector<8x32xbf16>
    %cst = arith.constant dense<0.000000e+00> : vector<8x128xf32>
    %21 = tpu.matmul %20, %3, %cst {dimension_numbers = #tpu.dot_dimension_numbers<[1], [0], [0], [1], [0, 0, 1, 1], [], []>} : vector<8x32xbf16>, vector<32x128xbf16>, vector<8x128xf32> -> vector<8x128xf32>
    %22 = arith.truncf %11 : vector<8x32xf32> to vector<8x32xbf16>
    %cst_31 = arith.constant dense<0.000000e+00> : vector<8x128xf32>
    %23 = tpu.matmul %22, %4, %cst_31 {dimension_numbers = #tpu.dot_dimension_numbers<[1], [0], [0], [1], [0, 0, 1, 1], [], []>} : vector<8x32xbf16>, vector<32x128xbf16>, vector<8x128xf32> -> vector<8x128xf32>
    %24 = arith.addf %23, %6 : vector<8x128xf32>
    %25 = arith.truncf %13 : vector<8x32xf32> to vector<8x32xbf16>
    %cst_32 = arith.constant dense<0.000000e+00> : vector<8x128xf32>
    %26 = tpu.matmul %25, %5, %cst_32 {dimension_numbers = #tpu.dot_dimension_numbers<[1], [0], [0], [1], [0, 0, 1, 1], [], []>} : vector<8x32xbf16>, vector<32x128xbf16>, vector<8x128xf32> -> vector<8x128xf32>
    %27 = arith.addf %26, %7 : vector<8x128xf32>
    %28 = arith.truncf %13 : vector<8x32xf32> to vector<8x32xbf16>
    %cst_33 = arith.constant dense<0.000000e+00> : vector<8x128xf32>
    %29 = tpu.matmul %28, %0, %cst_33 {dimension_numbers = #tpu.dot_dimension_numbers<[1], [0], [0], [1], [0, 0, 1, 1], [], []>} : vector<8x32xbf16>, vector<32x128xbf16>, vector<8x128xf32> -> vector<8x128xf32>
    %30 = arith.addf %29, %21 : vector<8x128xf32>
    %c0_34 = arith.constant 0 : index
    %c0_35 = arith.constant 0 : index
    %c0_36 = arith.constant 0 : index
    %31 = vector.load %arg0[%c0_34, %c0_35, %c0_36] : memref<6x8x128xf32, #tpu.memory_space<vmem>>, vector<1x8x128xf32>
    %32 = vector.shape_cast %31 : vector<1x8x128xf32> to vector<8x128xf32>
    %33 = arith.addf %30, %32 : vector<8x128xf32>
    %34 = arith.negf %33 : vector<8x128xf32>
    %35 = math.exp %34 : vector<8x128xf32>
    %cst_37 = arith.constant 1.000000e+00 : f32
    %36 = vector.broadcast %cst_37 : f32 to vector<8x128xf32>
    %37 = arith.addf %36, %35 : vector<8x128xf32>
    %38 = arith.divf %36, %37 : vector<8x128xf32>
    %39 = math.tanh %33 : vector<8x128xf32>
    %40 = vector.extract_strided_slice %38 {offsets = [0, 0], sizes = [8, 32], strides = [1, 1]} : vector<8x128xf32> to vector<8x32xf32>
    %41 = vector.extract_strided_slice %38 {offsets = [0, 32], sizes = [8, 32], strides = [1, 1]} : vector<8x128xf32> to vector<8x32xf32>
    %42 = vector.extract_strided_slice %39 {offsets = [0, 64], sizes = [8, 32], strides = [1, 1]} : vector<8x128xf32> to vector<8x32xf32>
    %43 = vector.extract_strided_slice %38 {offsets = [0, 96], sizes = [8, 32], strides = [1, 1]} : vector<8x128xf32> to vector<8x32xf32>
    %44 = arith.mulf %41, %15 : vector<8x32xf32>
    %45 = arith.mulf %40, %42 : vector<8x32xf32>
    %46 = arith.addf %44, %45 : vector<8x32xf32>
    %47 = math.tanh %46 : vector<8x32xf32>
    %48 = arith.mulf %43, %47 : vector<8x32xf32>
    %49 = arith.truncf %48 : vector<8x32xf32> to vector<8x32xbf16>
    %cst_38 = arith.constant dense<0.000000e+00> : vector<8x128xf32>
    %50 = tpu.matmul %49, %3, %cst_38 {dimension_numbers = #tpu.dot_dimension_numbers<[1], [0], [0], [1], [0, 0, 1, 1], [], []>} : vector<8x32xbf16>, vector<32x128xbf16>, vector<8x128xf32> -> vector<8x128xf32>
    %51 = arith.truncf %48 : vector<8x32xf32> to vector<8x32xbf16>
    %cst_39 = arith.constant dense<0.000000e+00> : vector<8x128xf32>
    %52 = tpu.matmul %51, %1, %cst_39 {dimension_numbers = #tpu.dot_dimension_numbers<[1], [0], [0], [1], [0, 0, 1, 1], [], []>} : vector<8x32xbf16>, vector<32x128xbf16>, vector<8x128xf32> -> vector<8x128xf32>
    %53 = arith.addf %52, %24 : vector<8x128xf32>
    %54 = arith.negf %53 : vector<8x128xf32>
    %55 = math.exp %54 : vector<8x128xf32>
    %cst_40 = arith.constant 1.000000e+00 : f32
    %56 = vector.broadcast %cst_40 : f32 to vector<8x128xf32>
    %57 = arith.addf %56, %55 : vector<8x128xf32>
    %58 = arith.divf %56, %57 : vector<8x128xf32>
    %59 = math.tanh %53 : vector<8x128xf32>
    %60 = vector.extract_strided_slice %58 {offsets = [0, 0], sizes = [8, 32], strides = [1, 1]} : vector<8x128xf32> to vector<8x32xf32>
    %61 = vector.extract_strided_slice %58 {offsets = [0, 32], sizes = [8, 32], strides = [1, 1]} : vector<8x128xf32> to vector<8x32xf32>
    %62 = vector.extract_strided_slice %59 {offsets = [0, 64], sizes = [8, 32], strides = [1, 1]} : vector<8x128xf32> to vector<8x32xf32>
    %63 = vector.extract_strided_slice %58 {offsets = [0, 96], sizes = [8, 32], strides = [1, 1]} : vector<8x128xf32> to vector<8x32xf32>
    %64 = arith.mulf %61, %17 : vector<8x32xf32>
    %65 = arith.mulf %60, %62 : vector<8x32xf32>
    %66 = arith.addf %64, %65 : vector<8x32xf32>
    %67 = math.tanh %66 : vector<8x32xf32>
    %68 = arith.mulf %63, %67 : vector<8x32xf32>
    %69 = arith.truncf %68 : vector<8x32xf32> to vector<8x32xbf16>
    %cst_41 = arith.constant dense<0.000000e+00> : vector<8x128xf32>
    %70 = tpu.matmul %69, %4, %cst_41 {dimension_numbers = #tpu.dot_dimension_numbers<[1], [0], [0], [1], [0, 0, 1, 1], [], []>} : vector<8x32xbf16>, vector<32x128xbf16>, vector<8x128xf32> -> vector<8x128xf32>
    %71 = arith.addf %70, %6 : vector<8x128xf32>
    %72 = arith.truncf %68 : vector<8x32xf32> to vector<8x32xbf16>
    %cst_42 = arith.constant dense<0.000000e+00> : vector<8x128xf32>
    %73 = tpu.matmul %72, %2, %cst_42 {dimension_numbers = #tpu.dot_dimension_numbers<[1], [0], [0], [1], [0, 0, 1, 1], [], []>} : vector<8x32xbf16>, vector<32x128xbf16>, vector<8x128xf32> -> vector<8x128xf32>
    %74 = arith.addf %73, %27 : vector<8x128xf32>
    %75 = arith.negf %74 : vector<8x128xf32>
    %76 = math.exp %75 : vector<8x128xf32>
    %cst_43 = arith.constant 1.000000e+00 : f32
    %77 = vector.broadcast %cst_43 : f32 to vector<8x128xf32>
    %78 = arith.addf %77, %76 : vector<8x128xf32>
    %79 = arith.divf %77, %78 : vector<8x128xf32>
    %80 = math.tanh %74 : vector<8x128xf32>
    %81 = vector.extract_strided_slice %79 {offsets = [0, 0], sizes = [8, 32], strides = [1, 1]} : vector<8x128xf32> to vector<8x32xf32>
    %82 = vector.extract_strided_slice %79 {offsets = [0, 32], sizes = [8, 32], strides = [1, 1]} : vector<8x128xf32> to vector<8x32xf32>
    %83 = vector.extract_strided_slice %80 {offsets = [0, 64], sizes = [8, 32], strides = [1, 1]} : vector<8x128xf32> to vector<8x32xf32>
    %84 = vector.extract_strided_slice %79 {offsets = [0, 96], sizes = [8, 32], strides = [1, 1]} : vector<8x128xf32> to vector<8x32xf32>
    %85 = arith.mulf %82, %19 : vector<8x32xf32>
    %86 = arith.mulf %81, %83 : vector<8x32xf32>
    %87 = arith.addf %85, %86 : vector<8x32xf32>
    %88 = math.tanh %87 : vector<8x32xf32>
    %89 = arith.mulf %84, %88 : vector<8x32xf32>
    %90 = arith.truncf %89 : vector<8x32xf32> to vector<8x32xbf16>
    %cst_44 = arith.constant dense<0.000000e+00> : vector<8x128xf32>
    %91 = tpu.matmul %90, %5, %cst_44 {dimension_numbers = #tpu.dot_dimension_numbers<[1], [0], [0], [1], [0, 0, 1, 1], [], []>} : vector<8x32xbf16>, vector<32x128xbf16>, vector<8x128xf32> -> vector<8x128xf32>
    %92 = arith.addf %91, %7 : vector<8x128xf32>
    %93 = arith.truncf %89 : vector<8x32xf32> to vector<8x32xbf16>
    %cst_45 = arith.constant dense<0.000000e+00> : vector<8x128xf32>
    %94 = tpu.matmul %93, %0, %cst_45 {dimension_numbers = #tpu.dot_dimension_numbers<[1], [0], [0], [1], [0, 0, 1, 1], [], []>} : vector<8x32xbf16>, vector<32x128xbf16>, vector<8x128xf32> -> vector<8x128xf32>
    %95 = arith.addf %94, %50 : vector<8x128xf32>
    %c1_46 = arith.constant 1 : index
    %c0_47 = arith.constant 0 : index
    %c0_48 = arith.constant 0 : index
    %96 = vector.load %arg0[%c1_46, %c0_47, %c0_48] : memref<6x8x128xf32, #tpu.memory_space<vmem>>, vector<1x8x128xf32>
    %97 = vector.shape_cast %96 : vector<1x8x128xf32> to vector<8x128xf32>
    %98 = arith.addf %95, %97 : vector<8x128xf32>
    %99 = arith.negf %98 : vector<8x128xf32>
    %100 = math.exp %99 : vector<8x128xf32>
    %cst_49 = arith.constant 1.000000e+00 : f32
    %101 = vector.broadcast %cst_49 : f32 to vector<8x128xf32>
    %102 = arith.addf %101, %100 : vector<8x128xf32>
    %103 = arith.divf %101, %102 : vector<8x128xf32>
    %104 = math.tanh %98 : vector<8x128xf32>
    %105 = vector.extract_strided_slice %103 {offsets = [0, 0], sizes = [8, 32], strides = [1, 1]} : vector<8x128xf32> to vector<8x32xf32>
    %106 = vector.extract_strided_slice %103 {offsets = [0, 32], sizes = [8, 32], strides = [1, 1]} : vector<8x128xf32> to vector<8x32xf32>
    %107 = vector.extract_strided_slice %104 {offsets = [0, 64], sizes = [8, 32], strides = [1, 1]} : vector<8x128xf32> to vector<8x32xf32>
    %108 = vector.extract_strided_slice %103 {offsets = [0, 96], sizes = [8, 32], strides = [1, 1]} : vector<8x128xf32> to vector<8x32xf32>
    %109 = arith.mulf %106, %46 : vector<8x32xf32>
    %110 = arith.mulf %105, %107 : vector<8x32xf32>
    %111 = arith.addf %109, %110 : vector<8x32xf32>
    %112 = math.tanh %111 : vector<8x32xf32>
    %113 = arith.mulf %108, %112 : vector<8x32xf32>
    %114 = arith.truncf %113 : vector<8x32xf32> to vector<8x32xbf16>
    %cst_50 = arith.constant dense<0.000000e+00> : vector<8x128xf32>
    %115 = tpu.matmul %114, %3, %cst_50 {dimension_numbers = #tpu.dot_dimension_numbers<[1], [0], [0], [1], [0, 0, 1, 1], [], []>} : vector<8x32xbf16>, vector<32x128xbf16>, vector<8x128xf32> -> vector<8x128xf32>
    %116 = arith.truncf %113 : vector<8x32xf32> to vector<8x32xbf16>
    %cst_51 = arith.constant dense<0.000000e+00> : vector<8x128xf32>
    %117 = tpu.matmul %116, %1, %cst_51 {dimension_numbers = #tpu.dot_dimension_numbers<[1], [0], [0], [1], [0, 0, 1, 1], [], []>} : vector<8x32xbf16>, vector<32x128xbf16>, vector<8x128xf32> -> vector<8x128xf32>
    %118 = arith.addf %117, %71 : vector<8x128xf32>
    %119 = arith.negf %118 : vector<8x128xf32>
    %120 = math.exp %119 : vector<8x128xf32>
    %cst_52 = arith.constant 1.000000e+00 : f32
    %121 = vector.broadcast %cst_52 : f32 to vector<8x128xf32>
    %122 = arith.addf %121, %120 : vector<8x128xf32>
    %123 = arith.divf %121, %122 : vector<8x128xf32>
    %124 = math.tanh %118 : vector<8x128xf32>
    %125 = vector.extract_strided_slice %123 {offsets = [0, 0], sizes = [8, 32], strides = [1, 1]} : vector<8x128xf32> to vector<8x32xf32>
    %126 = vector.extract_strided_slice %123 {offsets = [0, 32], sizes = [8, 32], strides = [1, 1]} : vector<8x128xf32> to vector<8x32xf32>
    %127 = vector.extract_strided_slice %124 {offsets = [0, 64], sizes = [8, 32], strides = [1, 1]} : vector<8x128xf32> to vector<8x32xf32>
    %128 = vector.extract_strided_slice %123 {offsets = [0, 96], sizes = [8, 32], strides = [1, 1]} : vector<8x128xf32> to vector<8x32xf32>
    %129 = arith.mulf %126, %66 : vector<8x32xf32>
    %130 = arith.mulf %125, %127 : vector<8x32xf32>
    %131 = arith.addf %129, %130 : vector<8x32xf32>
    %132 = math.tanh %131 : vector<8x32xf32>
    %133 = arith.mulf %128, %132 : vector<8x32xf32>
    %134 = arith.truncf %133 : vector<8x32xf32> to vector<8x32xbf16>
    %cst_53 = arith.constant dense<0.000000e+00> : vector<8x128xf32>
    %135 = tpu.matmul %134, %4, %cst_53 {dimension_numbers = #tpu.dot_dimension_numbers<[1], [0], [0], [1], [0, 0, 1, 1], [], []>} : vector<8x32xbf16>, vector<32x128xbf16>, vector<8x128xf32> -> vector<8x128xf32>
    %136 = arith.addf %135, %6 : vector<8x128xf32>
    %137 = arith.truncf %133 : vector<8x32xf32> to vector<8x32xbf16>
    %cst_54 = arith.constant dense<0.000000e+00> : vector<8x128xf32>
    %138 = tpu.matmul %137, %2, %cst_54 {dimension_numbers = #tpu.dot_dimension_numbers<[1], [0], [0], [1], [0, 0, 1, 1], [], []>} : vector<8x32xbf16>, vector<32x128xbf16>, vector<8x128xf32> -> vector<8x128xf32>
    %139 = arith.addf %138, %92 : vector<8x128xf32>
    %140 = arith.negf %139 : vector<8x128xf32>
    %141 = math.exp %140 : vector<8x128xf32>
    %cst_55 = arith.constant 1.000000e+00 : f32
    %142 = vector.broadcast %cst_55 : f32 to vector<8x128xf32>
    %143 = arith.addf %142, %141 : vector<8x128xf32>
    %144 = arith.divf %142, %143 : vector<8x128xf32>
    %145 = math.tanh %139 : vector<8x128xf32>
    %146 = vector.extract_strided_slice %144 {offsets = [0, 0], sizes = [8, 32], strides = [1, 1]} : vector<8x128xf32> to vector<8x32xf32>
    %147 = vector.extract_strided_slice %144 {offsets = [0, 32], sizes = [8, 32], strides = [1, 1]} : vector<8x128xf32> to vector<8x32xf32>
    %148 = vector.extract_strided_slice %145 {offsets = [0, 64], sizes = [8, 32], strides = [1, 1]} : vector<8x128xf32> to vector<8x32xf32>
    %149 = vector.extract_strided_slice %144 {offsets = [0, 96], sizes = [8, 32], strides = [1, 1]} : vector<8x128xf32> to vector<8x32xf32>
    %150 = arith.mulf %147, %87 : vector<8x32xf32>
    %151 = arith.mulf %146, %148 : vector<8x32xf32>
    %152 = arith.addf %150, %151 : vector<8x32xf32>
    %153 = math.tanh %152 : vector<8x32xf32>
    %154 = arith.mulf %149, %153 : vector<8x32xf32>
    %155 = arith.truncf %154 : vector<8x32xf32> to vector<8x32xbf16>
    %cst_56 = arith.constant dense<0.000000e+00> : vector<8x128xf32>
    %156 = tpu.matmul %155, %5, %cst_56 {dimension_numbers = #tpu.dot_dimension_numbers<[1], [0], [0], [1], [0, 0, 1, 1], [], []>} : vector<8x32xbf16>, vector<32x128xbf16>, vector<8x128xf32> -> vector<8x128xf32>
    %157 = arith.addf %156, %7 : vector<8x128xf32>
    %158 = arith.truncf %154 : vector<8x32xf32> to vector<8x32xbf16>
    %cst_57 = arith.constant dense<0.000000e+00> : vector<8x128xf32>
    %159 = tpu.matmul %158, %0, %cst_57 {dimension_numbers = #tpu.dot_dimension_numbers<[1], [0], [0], [1], [0, 0, 1, 1], [], []>} : vector<8x32xbf16>, vector<32x128xbf16>, vector<8x128xf32> -> vector<8x128xf32>
    %160 = arith.addf %159, %115 : vector<8x128xf32>
    %c2_58 = arith.constant 2 : index
    %c0_59 = arith.constant 0 : index
    %c0_60 = arith.constant 0 : index
    %161 = vector.load %arg0[%c2_58, %c0_59, %c0_60] : memref<6x8x128xf32, #tpu.memory_space<vmem>>, vector<1x8x128xf32>
    %162 = vector.shape_cast %161 : vector<1x8x128xf32> to vector<8x128xf32>
    %163 = arith.addf %160, %162 : vector<8x128xf32>
    %164 = arith.negf %163 : vector<8x128xf32>
    %165 = math.exp %164 : vector<8x128xf32>
    %cst_61 = arith.constant 1.000000e+00 : f32
    %166 = vector.broadcast %cst_61 : f32 to vector<8x128xf32>
    %167 = arith.addf %166, %165 : vector<8x128xf32>
    %168 = arith.divf %166, %167 : vector<8x128xf32>
    %169 = math.tanh %163 : vector<8x128xf32>
    %170 = vector.extract_strided_slice %168 {offsets = [0, 0], sizes = [8, 32], strides = [1, 1]} : vector<8x128xf32> to vector<8x32xf32>
    %171 = vector.extract_strided_slice %168 {offsets = [0, 32], sizes = [8, 32], strides = [1, 1]} : vector<8x128xf32> to vector<8x32xf32>
    %172 = vector.extract_strided_slice %169 {offsets = [0, 64], sizes = [8, 32], strides = [1, 1]} : vector<8x128xf32> to vector<8x32xf32>
    %173 = vector.extract_strided_slice %168 {offsets = [0, 96], sizes = [8, 32], strides = [1, 1]} : vector<8x128xf32> to vector<8x32xf32>
    %174 = arith.mulf %171, %111 : vector<8x32xf32>
    %175 = arith.mulf %170, %172 : vector<8x32xf32>
    %176 = arith.addf %174, %175 : vector<8x32xf32>
    %177 = math.tanh %176 : vector<8x32xf32>
    %178 = arith.mulf %173, %177 : vector<8x32xf32>
    %179 = arith.truncf %178 : vector<8x32xf32> to vector<8x32xbf16>
    %cst_62 = arith.constant dense<0.000000e+00> : vector<8x128xf32>
    %180 = tpu.matmul %179, %3, %cst_62 {dimension_numbers = #tpu.dot_dimension_numbers<[1], [0], [0], [1], [0, 0, 1, 1], [], []>} : vector<8x32xbf16>, vector<32x128xbf16>, vector<8x128xf32> -> vector<8x128xf32>
    %181 = arith.truncf %178 : vector<8x32xf32> to vector<8x32xbf16>
    %cst_63 = arith.constant dense<0.000000e+00> : vector<8x128xf32>
    %182 = tpu.matmul %181, %1, %cst_63 {dimension_numbers = #tpu.dot_dimension_numbers<[1], [0], [0], [1], [0, 0, 1, 1], [], []>} : vector<8x32xbf16>, vector<32x128xbf16>, vector<8x128xf32> -> vector<8x128xf32>
    %183 = arith.addf %182, %136 : vector<8x128xf32>
    %184 = arith.negf %183 : vector<8x128xf32>
    %185 = math.exp %184 : vector<8x128xf32>
    %cst_64 = arith.constant 1.000000e+00 : f32
    %186 = vector.broadcast %cst_64 : f32 to vector<8x128xf32>
    %187 = arith.addf %186, %185 : vector<8x128xf32>
    %188 = arith.divf %186, %187 : vector<8x128xf32>
    %189 = math.tanh %183 : vector<8x128xf32>
    %190 = vector.extract_strided_slice %188 {offsets = [0, 0], sizes = [8, 32], strides = [1, 1]} : vector<8x128xf32> to vector<8x32xf32>
    %191 = vector.extract_strided_slice %188 {offsets = [0, 32], sizes = [8, 32], strides = [1, 1]} : vector<8x128xf32> to vector<8x32xf32>
    %192 = vector.extract_strided_slice %189 {offsets = [0, 64], sizes = [8, 32], strides = [1, 1]} : vector<8x128xf32> to vector<8x32xf32>
    %193 = vector.extract_strided_slice %188 {offsets = [0, 96], sizes = [8, 32], strides = [1, 1]} : vector<8x128xf32> to vector<8x32xf32>
    %194 = arith.mulf %191, %131 : vector<8x32xf32>
    %195 = arith.mulf %190, %192 : vector<8x32xf32>
    %196 = arith.addf %194, %195 : vector<8x32xf32>
    %197 = math.tanh %196 : vector<8x32xf32>
    %198 = arith.mulf %193, %197 : vector<8x32xf32>
    %199 = arith.truncf %198 : vector<8x32xf32> to vector<8x32xbf16>
    %cst_65 = arith.constant dense<0.000000e+00> : vector<8x128xf32>
    %200 = tpu.matmul %199, %4, %cst_65 {dimension_numbers = #tpu.dot_dimension_numbers<[1], [0], [0], [1], [0, 0, 1, 1], [], []>} : vector<8x32xbf16>, vector<32x128xbf16>, vector<8x128xf32> -> vector<8x128xf32>
    %201 = arith.addf %200, %6 : vector<8x128xf32>
    %202 = arith.truncf %198 : vector<8x32xf32> to vector<8x32xbf16>
    %cst_66 = arith.constant dense<0.000000e+00> : vector<8x128xf32>
    %203 = tpu.matmul %202, %2, %cst_66 {dimension_numbers = #tpu.dot_dimension_numbers<[1], [0], [0], [1], [0, 0, 1, 1], [], []>} : vector<8x32xbf16>, vector<32x128xbf16>, vector<8x128xf32> -> vector<8x128xf32>
    %204 = arith.addf %203, %157 : vector<8x128xf32>
    %205 = arith.negf %204 : vector<8x128xf32>
    %206 = math.exp %205 : vector<8x128xf32>
    %cst_67 = arith.constant 1.000000e+00 : f32
    %207 = vector.broadcast %cst_67 : f32 to vector<8x128xf32>
    %208 = arith.addf %207, %206 : vector<8x128xf32>
    %209 = arith.divf %207, %208 : vector<8x128xf32>
    %210 = math.tanh %204 : vector<8x128xf32>
    %211 = vector.extract_strided_slice %209 {offsets = [0, 0], sizes = [8, 32], strides = [1, 1]} : vector<8x128xf32> to vector<8x32xf32>
    %212 = vector.extract_strided_slice %209 {offsets = [0, 32], sizes = [8, 32], strides = [1, 1]} : vector<8x128xf32> to vector<8x32xf32>
    %213 = vector.extract_strided_slice %210 {offsets = [0, 64], sizes = [8, 32], strides = [1, 1]} : vector<8x128xf32> to vector<8x32xf32>
    %214 = vector.extract_strided_slice %209 {offsets = [0, 96], sizes = [8, 32], strides = [1, 1]} : vector<8x128xf32> to vector<8x32xf32>
    %215 = arith.mulf %212, %152 : vector<8x32xf32>
    %216 = arith.mulf %211, %213 : vector<8x32xf32>
    %217 = arith.addf %215, %216 : vector<8x32xf32>
    %218 = math.tanh %217 : vector<8x32xf32>
    %219 = arith.mulf %214, %218 : vector<8x32xf32>
    %220 = arith.truncf %219 : vector<8x32xf32> to vector<8x32xbf16>
    %cst_68 = arith.constant dense<0.000000e+00> : vector<8x128xf32>
    %221 = tpu.matmul %220, %5, %cst_68 {dimension_numbers = #tpu.dot_dimension_numbers<[1], [0], [0], [1], [0, 0, 1, 1], [], []>} : vector<8x32xbf16>, vector<32x128xbf16>, vector<8x128xf32> -> vector<8x128xf32>
    %222 = arith.addf %221, %7 : vector<8x128xf32>
    %223 = arith.truncf %219 : vector<8x32xf32> to vector<8x32xbf16>
    %cst_69 = arith.constant dense<0.000000e+00> : vector<8x128xf32>
    %224 = tpu.matmul %223, %0, %cst_69 {dimension_numbers = #tpu.dot_dimension_numbers<[1], [0], [0], [1], [0, 0, 1, 1], [], []>} : vector<8x32xbf16>, vector<32x128xbf16>, vector<8x128xf32> -> vector<8x128xf32>
    %225 = arith.addf %224, %180 : vector<8x128xf32>
    %c3 = arith.constant 3 : index
    %c0_70 = arith.constant 0 : index
    %c0_71 = arith.constant 0 : index
    %226 = vector.load %arg0[%c3, %c0_70, %c0_71] : memref<6x8x128xf32, #tpu.memory_space<vmem>>, vector<1x8x128xf32>
    %227 = vector.shape_cast %226 : vector<1x8x128xf32> to vector<8x128xf32>
    %228 = arith.addf %225, %227 : vector<8x128xf32>
    %229 = arith.negf %228 : vector<8x128xf32>
    %230 = math.exp %229 : vector<8x128xf32>
    %cst_72 = arith.constant 1.000000e+00 : f32
    %231 = vector.broadcast %cst_72 : f32 to vector<8x128xf32>
    %232 = arith.addf %231, %230 : vector<8x128xf32>
    %233 = arith.divf %231, %232 : vector<8x128xf32>
    %234 = math.tanh %228 : vector<8x128xf32>
    %235 = vector.extract_strided_slice %233 {offsets = [0, 0], sizes = [8, 32], strides = [1, 1]} : vector<8x128xf32> to vector<8x32xf32>
    %236 = vector.extract_strided_slice %233 {offsets = [0, 32], sizes = [8, 32], strides = [1, 1]} : vector<8x128xf32> to vector<8x32xf32>
    %237 = vector.extract_strided_slice %234 {offsets = [0, 64], sizes = [8, 32], strides = [1, 1]} : vector<8x128xf32> to vector<8x32xf32>
    %238 = vector.extract_strided_slice %233 {offsets = [0, 96], sizes = [8, 32], strides = [1, 1]} : vector<8x128xf32> to vector<8x32xf32>
    %239 = arith.mulf %236, %176 : vector<8x32xf32>
    %240 = arith.mulf %235, %237 : vector<8x32xf32>
    %241 = arith.addf %239, %240 : vector<8x32xf32>
    %242 = math.tanh %241 : vector<8x32xf32>
    %243 = arith.mulf %238, %242 : vector<8x32xf32>
    %244 = arith.truncf %243 : vector<8x32xf32> to vector<8x32xbf16>
    %cst_73 = arith.constant dense<0.000000e+00> : vector<8x128xf32>
    %245 = tpu.matmul %244, %3, %cst_73 {dimension_numbers = #tpu.dot_dimension_numbers<[1], [0], [0], [1], [0, 0, 1, 1], [], []>} : vector<8x32xbf16>, vector<32x128xbf16>, vector<8x128xf32> -> vector<8x128xf32>
    %246 = arith.truncf %243 : vector<8x32xf32> to vector<8x32xbf16>
    %cst_74 = arith.constant dense<0.000000e+00> : vector<8x128xf32>
    %247 = tpu.matmul %246, %1, %cst_74 {dimension_numbers = #tpu.dot_dimension_numbers<[1], [0], [0], [1], [0, 0, 1, 1], [], []>} : vector<8x32xbf16>, vector<32x128xbf16>, vector<8x128xf32> -> vector<8x128xf32>
    %248 = arith.addf %247, %201 : vector<8x128xf32>
    %249 = arith.negf %248 : vector<8x128xf32>
    %250 = math.exp %249 : vector<8x128xf32>
    %cst_75 = arith.constant 1.000000e+00 : f32
    %251 = vector.broadcast %cst_75 : f32 to vector<8x128xf32>
    %252 = arith.addf %251, %250 : vector<8x128xf32>
    %253 = arith.divf %251, %252 : vector<8x128xf32>
    %254 = math.tanh %248 : vector<8x128xf32>
    %255 = vector.extract_strided_slice %253 {offsets = [0, 0], sizes = [8, 32], strides = [1, 1]} : vector<8x128xf32> to vector<8x32xf32>
    %256 = vector.extract_strided_slice %253 {offsets = [0, 32], sizes = [8, 32], strides = [1, 1]} : vector<8x128xf32> to vector<8x32xf32>
    %257 = vector.extract_strided_slice %254 {offsets = [0, 64], sizes = [8, 32], strides = [1, 1]} : vector<8x128xf32> to vector<8x32xf32>
    %258 = vector.extract_strided_slice %253 {offsets = [0, 96], sizes = [8, 32], strides = [1, 1]} : vector<8x128xf32> to vector<8x32xf32>
    %259 = arith.mulf %256, %196 : vector<8x32xf32>
    %260 = arith.mulf %255, %257 : vector<8x32xf32>
    %261 = arith.addf %259, %260 : vector<8x32xf32>
    %262 = math.tanh %261 : vector<8x32xf32>
    %263 = arith.mulf %258, %262 : vector<8x32xf32>
    %264 = arith.truncf %263 : vector<8x32xf32> to vector<8x32xbf16>
    %cst_76 = arith.constant dense<0.000000e+00> : vector<8x128xf32>
    %265 = tpu.matmul %264, %4, %cst_76 {dimension_numbers = #tpu.dot_dimension_numbers<[1], [0], [0], [1], [0, 0, 1, 1], [], []>} : vector<8x32xbf16>, vector<32x128xbf16>, vector<8x128xf32> -> vector<8x128xf32>
    %266 = arith.addf %265, %6 : vector<8x128xf32>
    %267 = arith.truncf %263 : vector<8x32xf32> to vector<8x32xbf16>
    %cst_77 = arith.constant dense<0.000000e+00> : vector<8x128xf32>
    %268 = tpu.matmul %267, %2, %cst_77 {dimension_numbers = #tpu.dot_dimension_numbers<[1], [0], [0], [1], [0, 0, 1, 1], [], []>} : vector<8x32xbf16>, vector<32x128xbf16>, vector<8x128xf32> -> vector<8x128xf32>
    %269 = arith.addf %268, %222 : vector<8x128xf32>
    %270 = arith.negf %269 : vector<8x128xf32>
    %271 = math.exp %270 : vector<8x128xf32>
    %cst_78 = arith.constant 1.000000e+00 : f32
    %272 = vector.broadcast %cst_78 : f32 to vector<8x128xf32>
    %273 = arith.addf %272, %271 : vector<8x128xf32>
    %274 = arith.divf %272, %273 : vector<8x128xf32>
    %275 = math.tanh %269 : vector<8x128xf32>
    %276 = vector.extract_strided_slice %274 {offsets = [0, 0], sizes = [8, 32], strides = [1, 1]} : vector<8x128xf32> to vector<8x32xf32>
    %277 = vector.extract_strided_slice %274 {offsets = [0, 32], sizes = [8, 32], strides = [1, 1]} : vector<8x128xf32> to vector<8x32xf32>
    %278 = vector.extract_strided_slice %275 {offsets = [0, 64], sizes = [8, 32], strides = [1, 1]} : vector<8x128xf32> to vector<8x32xf32>
    %279 = vector.extract_strided_slice %274 {offsets = [0, 96], sizes = [8, 32], strides = [1, 1]} : vector<8x128xf32> to vector<8x32xf32>
    %280 = arith.mulf %277, %217 : vector<8x32xf32>
    %281 = arith.mulf %276, %278 : vector<8x32xf32>
    %282 = arith.addf %280, %281 : vector<8x32xf32>
    %283 = math.tanh %282 : vector<8x32xf32>
    %284 = arith.mulf %279, %283 : vector<8x32xf32>
    %285 = arith.truncf %284 : vector<8x32xf32> to vector<8x32xbf16>
    %cst_79 = arith.constant dense<0.000000e+00> : vector<8x128xf32>
    %286 = tpu.matmul %285, %5, %cst_79 {dimension_numbers = #tpu.dot_dimension_numbers<[1], [0], [0], [1], [0, 0, 1, 1], [], []>} : vector<8x32xbf16>, vector<32x128xbf16>, vector<8x128xf32> -> vector<8x128xf32>
    %287 = arith.addf %286, %7 : vector<8x128xf32>
    %288 = arith.truncf %284 : vector<8x32xf32> to vector<8x32xbf16>
    %cst_80 = arith.constant dense<0.000000e+00> : vector<8x128xf32>
    %289 = tpu.matmul %288, %0, %cst_80 {dimension_numbers = #tpu.dot_dimension_numbers<[1], [0], [0], [1], [0, 0, 1, 1], [], []>} : vector<8x32xbf16>, vector<32x128xbf16>, vector<8x128xf32> -> vector<8x128xf32>
    %290 = arith.addf %289, %245 : vector<8x128xf32>
    %c4 = arith.constant 4 : index
    %c0_81 = arith.constant 0 : index
    %c0_82 = arith.constant 0 : index
    %291 = vector.load %arg0[%c4, %c0_81, %c0_82] : memref<6x8x128xf32, #tpu.memory_space<vmem>>, vector<1x8x128xf32>
    %292 = vector.shape_cast %291 : vector<1x8x128xf32> to vector<8x128xf32>
    %293 = arith.addf %290, %292 : vector<8x128xf32>
    %294 = arith.negf %293 : vector<8x128xf32>
    %295 = math.exp %294 : vector<8x128xf32>
    %cst_83 = arith.constant 1.000000e+00 : f32
    %296 = vector.broadcast %cst_83 : f32 to vector<8x128xf32>
    %297 = arith.addf %296, %295 : vector<8x128xf32>
    %298 = arith.divf %296, %297 : vector<8x128xf32>
    %299 = math.tanh %293 : vector<8x128xf32>
    %300 = vector.extract_strided_slice %298 {offsets = [0, 0], sizes = [8, 32], strides = [1, 1]} : vector<8x128xf32> to vector<8x32xf32>
    %301 = vector.extract_strided_slice %298 {offsets = [0, 32], sizes = [8, 32], strides = [1, 1]} : vector<8x128xf32> to vector<8x32xf32>
    %302 = vector.extract_strided_slice %299 {offsets = [0, 64], sizes = [8, 32], strides = [1, 1]} : vector<8x128xf32> to vector<8x32xf32>
    %303 = vector.extract_strided_slice %298 {offsets = [0, 96], sizes = [8, 32], strides = [1, 1]} : vector<8x128xf32> to vector<8x32xf32>
    %304 = arith.mulf %301, %241 : vector<8x32xf32>
    %305 = arith.mulf %300, %302 : vector<8x32xf32>
    %306 = arith.addf %304, %305 : vector<8x32xf32>
    %307 = math.tanh %306 : vector<8x32xf32>
    %308 = arith.mulf %303, %307 : vector<8x32xf32>
    %309 = arith.truncf %308 : vector<8x32xf32> to vector<8x32xbf16>
    %cst_84 = arith.constant dense<0.000000e+00> : vector<8x128xf32>
    %310 = tpu.matmul %309, %3, %cst_84 {dimension_numbers = #tpu.dot_dimension_numbers<[1], [0], [0], [1], [0, 0, 1, 1], [], []>} : vector<8x32xbf16>, vector<32x128xbf16>, vector<8x128xf32> -> vector<8x128xf32>
    %311 = arith.truncf %308 : vector<8x32xf32> to vector<8x32xbf16>
    %cst_85 = arith.constant dense<0.000000e+00> : vector<8x128xf32>
    %312 = tpu.matmul %311, %1, %cst_85 {dimension_numbers = #tpu.dot_dimension_numbers<[1], [0], [0], [1], [0, 0, 1, 1], [], []>} : vector<8x32xbf16>, vector<32x128xbf16>, vector<8x128xf32> -> vector<8x128xf32>
    %313 = arith.addf %312, %266 : vector<8x128xf32>
    %314 = arith.negf %313 : vector<8x128xf32>
    %315 = math.exp %314 : vector<8x128xf32>
    %cst_86 = arith.constant 1.000000e+00 : f32
    %316 = vector.broadcast %cst_86 : f32 to vector<8x128xf32>
    %317 = arith.addf %316, %315 : vector<8x128xf32>
    %318 = arith.divf %316, %317 : vector<8x128xf32>
    %319 = math.tanh %313 : vector<8x128xf32>
    %320 = vector.extract_strided_slice %318 {offsets = [0, 0], sizes = [8, 32], strides = [1, 1]} : vector<8x128xf32> to vector<8x32xf32>
    %321 = vector.extract_strided_slice %318 {offsets = [0, 32], sizes = [8, 32], strides = [1, 1]} : vector<8x128xf32> to vector<8x32xf32>
    %322 = vector.extract_strided_slice %319 {offsets = [0, 64], sizes = [8, 32], strides = [1, 1]} : vector<8x128xf32> to vector<8x32xf32>
    %323 = vector.extract_strided_slice %318 {offsets = [0, 96], sizes = [8, 32], strides = [1, 1]} : vector<8x128xf32> to vector<8x32xf32>
    %324 = arith.mulf %321, %261 : vector<8x32xf32>
    %325 = arith.mulf %320, %322 : vector<8x32xf32>
    %326 = arith.addf %324, %325 : vector<8x32xf32>
    %327 = math.tanh %326 : vector<8x32xf32>
    %328 = arith.mulf %323, %327 : vector<8x32xf32>
    %329 = arith.truncf %328 : vector<8x32xf32> to vector<8x32xbf16>
    %cst_87 = arith.constant dense<0.000000e+00> : vector<8x128xf32>
    %330 = tpu.matmul %329, %4, %cst_87 {dimension_numbers = #tpu.dot_dimension_numbers<[1], [0], [0], [1], [0, 0, 1, 1], [], []>} : vector<8x32xbf16>, vector<32x128xbf16>, vector<8x128xf32> -> vector<8x128xf32>
    %331 = arith.addf %330, %6 : vector<8x128xf32>
    %332 = arith.truncf %328 : vector<8x32xf32> to vector<8x32xbf16>
    %cst_88 = arith.constant dense<0.000000e+00> : vector<8x128xf32>
    %333 = tpu.matmul %332, %2, %cst_88 {dimension_numbers = #tpu.dot_dimension_numbers<[1], [0], [0], [1], [0, 0, 1, 1], [], []>} : vector<8x32xbf16>, vector<32x128xbf16>, vector<8x128xf32> -> vector<8x128xf32>
    %334 = arith.addf %333, %287 : vector<8x128xf32>
    %335 = arith.negf %334 : vector<8x128xf32>
    %336 = math.exp %335 : vector<8x128xf32>
    %cst_89 = arith.constant 1.000000e+00 : f32
    %337 = vector.broadcast %cst_89 : f32 to vector<8x128xf32>
    %338 = arith.addf %337, %336 : vector<8x128xf32>
    %339 = arith.divf %337, %338 : vector<8x128xf32>
    %340 = math.tanh %334 : vector<8x128xf32>
    %341 = vector.extract_strided_slice %339 {offsets = [0, 0], sizes = [8, 32], strides = [1, 1]} : vector<8x128xf32> to vector<8x32xf32>
    %342 = vector.extract_strided_slice %339 {offsets = [0, 32], sizes = [8, 32], strides = [1, 1]} : vector<8x128xf32> to vector<8x32xf32>
    %343 = vector.extract_strided_slice %340 {offsets = [0, 64], sizes = [8, 32], strides = [1, 1]} : vector<8x128xf32> to vector<8x32xf32>
    %344 = vector.extract_strided_slice %339 {offsets = [0, 96], sizes = [8, 32], strides = [1, 1]} : vector<8x128xf32> to vector<8x32xf32>
    %345 = arith.mulf %342, %282 : vector<8x32xf32>
    %346 = arith.mulf %341, %343 : vector<8x32xf32>
    %347 = arith.addf %345, %346 : vector<8x32xf32>
    %348 = math.tanh %347 : vector<8x32xf32>
    %349 = arith.mulf %344, %348 : vector<8x32xf32>
    %350 = arith.truncf %349 : vector<8x32xf32> to vector<8x32xbf16>
    %cst_90 = arith.constant dense<0.000000e+00> : vector<8x128xf32>
    %351 = tpu.matmul %350, %5, %cst_90 {dimension_numbers = #tpu.dot_dimension_numbers<[1], [0], [0], [1], [0, 0, 1, 1], [], []>} : vector<8x32xbf16>, vector<32x128xbf16>, vector<8x128xf32> -> vector<8x128xf32>
    %352 = arith.addf %351, %7 : vector<8x128xf32>
    %353 = arith.truncf %349 : vector<8x32xf32> to vector<8x32xbf16>
    %cst_91 = arith.constant dense<0.000000e+00> : vector<8x128xf32>
    %354 = tpu.matmul %353, %0, %cst_91 {dimension_numbers = #tpu.dot_dimension_numbers<[1], [0], [0], [1], [0, 0, 1, 1], [], []>} : vector<8x32xbf16>, vector<32x128xbf16>, vector<8x128xf32> -> vector<8x128xf32>
    %355 = arith.addf %354, %310 : vector<8x128xf32>
    %c5 = arith.constant 5 : index
    %c0_92 = arith.constant 0 : index
    %c0_93 = arith.constant 0 : index
    %356 = vector.load %arg0[%c5, %c0_92, %c0_93] : memref<6x8x128xf32, #tpu.memory_space<vmem>>, vector<1x8x128xf32>
    %357 = vector.shape_cast %356 : vector<1x8x128xf32> to vector<8x128xf32>
    %358 = arith.addf %355, %357 : vector<8x128xf32>
    %359 = arith.negf %358 : vector<8x128xf32>
    %360 = math.exp %359 : vector<8x128xf32>
    %cst_94 = arith.constant 1.000000e+00 : f32
    %361 = vector.broadcast %cst_94 : f32 to vector<8x128xf32>
    %362 = arith.addf %361, %360 : vector<8x128xf32>
    %363 = arith.divf %361, %362 : vector<8x128xf32>
    %364 = math.tanh %358 : vector<8x128xf32>
    %365 = vector.extract_strided_slice %363 {offsets = [0, 0], sizes = [8, 32], strides = [1, 1]} : vector<8x128xf32> to vector<8x32xf32>
    %366 = vector.extract_strided_slice %363 {offsets = [0, 32], sizes = [8, 32], strides = [1, 1]} : vector<8x128xf32> to vector<8x32xf32>
    %367 = vector.extract_strided_slice %364 {offsets = [0, 64], sizes = [8, 32], strides = [1, 1]} : vector<8x128xf32> to vector<8x32xf32>
    %368 = vector.extract_strided_slice %363 {offsets = [0, 96], sizes = [8, 32], strides = [1, 1]} : vector<8x128xf32> to vector<8x32xf32>
    %369 = arith.mulf %366, %306 : vector<8x32xf32>
    %370 = arith.mulf %365, %367 : vector<8x32xf32>
    %371 = arith.addf %369, %370 : vector<8x32xf32>
    %372 = math.tanh %371 : vector<8x32xf32>
    %373 = arith.mulf %368, %372 : vector<8x32xf32>
    %374 = arith.truncf %373 : vector<8x32xf32> to vector<8x32xbf16>
    %cst_95 = arith.constant dense<0.000000e+00> : vector<8x128xf32>
    %375 = tpu.matmul %374, %1, %cst_95 {dimension_numbers = #tpu.dot_dimension_numbers<[1], [0], [0], [1], [0, 0, 1, 1], [], []>} : vector<8x32xbf16>, vector<32x128xbf16>, vector<8x128xf32> -> vector<8x128xf32>
    %376 = arith.addf %375, %331 : vector<8x128xf32>
    %377 = arith.negf %376 : vector<8x128xf32>
    %378 = math.exp %377 : vector<8x128xf32>
    %cst_96 = arith.constant 1.000000e+00 : f32
    %379 = vector.broadcast %cst_96 : f32 to vector<8x128xf32>
    %380 = arith.addf %379, %378 : vector<8x128xf32>
    %381 = arith.divf %379, %380 : vector<8x128xf32>
    %382 = math.tanh %376 : vector<8x128xf32>
    %383 = vector.extract_strided_slice %381 {offsets = [0, 0], sizes = [8, 32], strides = [1, 1]} : vector<8x128xf32> to vector<8x32xf32>
    %384 = vector.extract_strided_slice %381 {offsets = [0, 32], sizes = [8, 32], strides = [1, 1]} : vector<8x128xf32> to vector<8x32xf32>
    %385 = vector.extract_strided_slice %382 {offsets = [0, 64], sizes = [8, 32], strides = [1, 1]} : vector<8x128xf32> to vector<8x32xf32>
    %386 = vector.extract_strided_slice %381 {offsets = [0, 96], sizes = [8, 32], strides = [1, 1]} : vector<8x128xf32> to vector<8x32xf32>
    %387 = arith.mulf %384, %326 : vector<8x32xf32>
    %388 = arith.mulf %383, %385 : vector<8x32xf32>
    %389 = arith.addf %387, %388 : vector<8x32xf32>
    %390 = math.tanh %389 : vector<8x32xf32>
    %391 = arith.mulf %386, %390 : vector<8x32xf32>
    %392 = arith.truncf %391 : vector<8x32xf32> to vector<8x32xbf16>
    %cst_97 = arith.constant dense<0.000000e+00> : vector<8x128xf32>
    %393 = tpu.matmul %392, %2, %cst_97 {dimension_numbers = #tpu.dot_dimension_numbers<[1], [0], [0], [1], [0, 0, 1, 1], [], []>} : vector<8x32xbf16>, vector<32x128xbf16>, vector<8x128xf32> -> vector<8x128xf32>
    %394 = arith.addf %393, %352 : vector<8x128xf32>
    %395 = arith.negf %394 : vector<8x128xf32>
    %396 = math.exp %395 : vector<8x128xf32>
    %cst_98 = arith.constant 1.000000e+00 : f32
    %397 = vector.broadcast %cst_98 : f32 to vector<8x128xf32>
    %398 = arith.addf %397, %396 : vector<8x128xf32>
    %399 = arith.divf %397, %398 : vector<8x128xf32>
    %400 = math.tanh %394 : vector<8x128xf32>
    %401 = vector.extract_strided_slice %399 {offsets = [0, 0], sizes = [8, 32], strides = [1, 1]} : vector<8x128xf32> to vector<8x32xf32>
    %402 = vector.extract_strided_slice %399 {offsets = [0, 32], sizes = [8, 32], strides = [1, 1]} : vector<8x128xf32> to vector<8x32xf32>
    %403 = vector.extract_strided_slice %400 {offsets = [0, 64], sizes = [8, 32], strides = [1, 1]} : vector<8x128xf32> to vector<8x32xf32>
    %404 = vector.extract_strided_slice %399 {offsets = [0, 96], sizes = [8, 32], strides = [1, 1]} : vector<8x128xf32> to vector<8x32xf32>
    %405 = arith.mulf %402, %347 : vector<8x32xf32>
    %406 = arith.mulf %401, %403 : vector<8x32xf32>
    %407 = arith.addf %405, %406 : vector<8x32xf32>
    %408 = math.tanh %407 : vector<8x32xf32>
    %409 = arith.mulf %404, %408 : vector<8x32xf32>
    %410 = tpu.concatenate %89, %154, %219, %284, %349, %409 in 0 : vector<8x32xf32>, vector<8x32xf32>, vector<8x32xf32>, vector<8x32xf32>, vector<8x32xf32>, vector<8x32xf32> -> vector<48x32xf32>
    %411 = arith.truncf %410 : vector<48x32xf32> to vector<48x32xbf16>
    %c0_99 = arith.constant 0 : index
    %c0_100 = arith.constant 0 : index
    %412 = vector.load %arg11[%c0_99, %c0_100] : memref<32x4xbf16, #tpu.memory_space<vmem>>, vector<32x4xbf16>
    %cst_101 = arith.constant dense<0.000000e+00> : vector<48x4xf32>
    %413 = tpu.matmul %411, %412, %cst_101 {dimension_numbers = #tpu.dot_dimension_numbers<[1], [0], [0], [1], [0, 0, 1, 1], [], []>} : vector<48x32xbf16>, vector<32x4xbf16>, vector<48x4xf32> -> vector<48x4xf32>
    %c0_102 = arith.constant 0 : index
    %c0_103 = arith.constant 0 : index
    %414 = vector.load %arg12[%c0_102, %c0_103] : memref<1x4xf32, #tpu.memory_space<vmem>>, vector<1x4xf32>
    %415 = vector.broadcast %414 : vector<1x4xf32> to vector<48x4xf32>
    %416 = arith.addf %413, %415 : vector<48x4xf32>
    %417 = tpu.iota {dimensions = array<i32: 1>} : vector<48x4xi32>
    %cst_104 = arith.constant 0.000000e+00 : f32
    %418 = vector.broadcast %cst_104 : f32 to vector<48x4xf32>
    %419 = arith.maximumf %416, %418 : vector<48x4xf32>
    %420 = math.absf %416 : vector<48x4xf32>
    %cst_105 = arith.constant 0.000000e+00 : f32
    %421 = vector.broadcast %cst_105 : f32 to vector<48x4xf32>
    %422 = arith.subf %421, %420 : vector<48x4xf32>
    %423 = math.exp %422 : vector<48x4xf32>
    %cst_106 = arith.constant 1.000000e+00 : f32
    %424 = vector.broadcast %cst_106 : f32 to vector<48x4xf32>
    %425 = arith.addf %424, %423 : vector<48x4xf32>
    %426 = math.log %425 : vector<48x4xf32>
    %427 = arith.addf %419, %426 : vector<48x4xf32>
    %c2_i32 = arith.constant 2 : i32
    %428 = vector.broadcast %c2_i32 : i32 to vector<48x4xi32>
    %429 = arith.cmpi sge, %417, %428 : vector<48x4xi32>
    %430 = arith.select %429, %427, %416 : vector<48x4xi1>, vector<48x4xf32>
    %c0_107 = arith.constant 0 : index
    %c0_108 = arith.constant 0 : index
    %431 = vector.load %arg13[%c0_107, %c0_108] : memref<48x4xf32, #tpu.memory_space<vmem>>, vector<48x4xf32>
    tpu.vector_store %arg13[%c0_107, %c0_108], %430 {strides = array<i32>} : memref<48x4xf32, #tpu.memory_space<vmem>>, vector<48x4xf32>,
    return
  }
}

</mosaic_0001>

<bundles_post_ra>
// kernel: lstm_decoder_pallas.1
= control target key start
LH: loop header
LB: loop body
LE: loop exit
PB: predicated region body
PF: predicated region fallthrough
CT: control target
= control target key end

     0   :  { %vm94_vm0 = vcmask 261120   ;;  %s1902_s21 = smov 64   ;;  %s1903_s24 = smov 32   ;;  %s2495_s4 = inlined_call_operand.vmem [shape: bf16[32,128], index: 4, kind: input, shape index: {}]   ;;  %s2496_s3 = inlined_call_operand.vmem [shape: bf16[32,128], index: 3, kind: input, shape index: {}]   ;;  %s2497_s1 = inlined_call_operand.vmem [shape: f32[3,8,32], index: 1, kind: input, shape index: {}]   ;;  %s2498_s0 = inlined_call_operand.vmem [shape: f32[6,8,128], index: 0, kind: input, shape index: {}]   ;;  %s2499_s2 = inlined_call_operand.vmem [shape: f32[3,8,32], index: 2, kind: input, shape index: {}]   ;;  %s2500_s6 = inlined_call_operand.vmem [shape: bf16[32,128], index: 6, kind: input, shape index: {}]   ;;  %s2501_s8 = inlined_call_operand.vmem [shape: bf16[32,128], index: 8, kind: input, shape index: {}]   ;;  %s2502_s5 = inlined_call_operand.vmem [shape: bf16[32,128], index: 5, kind: input, shape index: {}]   ;;  %s2503_s9 = inlined_call_operand.vmem [shape: f32[8,128], index: 9, kind: input, shape index: {}]   ;;  %s2504_s7 = inlined_call_operand.vmem [shape: bf16[32,128], index: 7, kind: input, shape index: {}]   ;;  %s2505_s10 = inlined_call_operand.vmem [shape: f32[8,128], index: 10, kind: input, shape index: {}]   ;;  %s2506_s11 = inlined_call_operand.vmem [shape: bf16[32,4], index: 11, kind: input, shape index: {}]   ;;  %s2507_s12 = inlined_call_operand.vmem [shape: f32[1,4], index: 12, kind: input, shape index: {}]   ;;  %s2508_s13 = inlined_call_operand.vmem [shape: f32[48,4], index: 13, kind: output, shape index: {}]  }
   0x1   :  { %v1977_v0 = vld [vmem:[%s2495_s4 + $0x8] sm:$0xff]  ;;  %v1987_v2 = vld [vmem:[%s2495_s4] sm:$0xff]  ;;  %v1588_v5 = vld [vmem:[%s2497_s1 + $0x10] sm:$0xff] }
   0x2   :  { %v1982_v1 = vld [vmem:[%s2496_s3 + $0x8] sm:$0xff]  ;;  %104 = vmatpush.bf16.msra.mxu1 %v1977_v0  ;;  %v1994_v3 = vld [vmem:[%s2496_s3] sm:$0xff]  ;;  %v2002_v7 = vpack.c.bf16 %v1588_v5, %v1588_v5 }
   0x3   :  { %187 = vmatpush.bf16.msra.mxu3 %v1982_v1  ;;  %v71_v4 = vld [vmem:[%s2497_s1] sm:$0xff]  ;;  %v2025_v37 = vld [vmem:[%s2500_s6 + $0x8] sm:$0xff] }
   0x4   :  { %v81_v6 = vpack.c.bf16 %v71_v4, %v71_v4  ;;  %v194_v10 = vld [vmem:[%s2498_s0] sm:$0xff]  ;;  %v2030_v38 = vld [vmem:[%s2501_s8 + $0x8] sm:$0xff] }
   0x5   :  { %v76_v16 = vld [vmem:[%s2499_s2] sm:$0xff]  ;;  %v1587_v40 = vld [vmem:[%s2497_s1 + $0x8] sm:$0xff]  ;;  %162 = vmatpush.bf16.msra.mxu2 %v2030_v38  ;;  %422 = vmatpush.bf16.msra.mxu0 %v2030_v38 }
   0x6   :  { %105 = vmatpush.bf16.msra.mxu1 %v1987_v2  ;;  %v2036_v39 = vld [vmem:[%s2500_s6] sm:$0xff]  ;;  %v2050_v42 = vld [vmem:[%s2502_s5 + $0x8] sm:$0xff]  ;;  %v111_v43 = vpack.c.bf16 %v1587_v40, %v1587_v40 }
   0x7   :  { %188 = vmatpush.bf16.msra.mxu3 %v1994_v3  ;;  %v2045_v41 = vld [vmem:[%s2501_s8] sm:$0xff]  ;;  %v1589_v48 = vld [vmem:[%s2499_s2 + $0x8] sm:$0xff] }
   0x8   :  { %v2059_v44 = vld [vmem:[%s2502_s5] sm:$0xff] }
   0x9   :  { %1599 = vmatmul.msk.bf16.vlgmr.msra.gmra.mxu1 %vm94_vm0, %v81_v6  ;;  %163 = vmatpush.bf16.msra.mxu2 %v2045_v41  ;;  %v2088_v54 = vld [vmem:[%s2503_s9] sm:$0xff] }
   0xa   :  { %1626 = vmatmul.msk.bf16.vlgmr.msra.gmra.mxu3 %vm94_vm0, %v2002_v7  ;;  %133 = vmatpush.bf16.msrb.mxu1 %v2025_v37 }
   0xb   :  { %423 = vmatpush.bf16.msra.mxu0 %v2045_v41 }
   0xc   :  { %1617 = vmatmul.msk.bf16.vlgmr.msra.gmra.mxu2 %vm94_vm0, %v2002_v7 }
   0xd   :  { %250 = vmatpush.bf16.msrb.mxu2 %v1977_v0 }
   0xe   :  { %134 = vmatpush.bf16.msrb.mxu1 %v2036_v39 }
   0xf   :  { %565 = vmatpush.bf16.msrb.mxu0 %v2025_v37 }
  0x11   :  { %251 = vmatpush.bf16.msrb.mxu2 %v1987_v2 }
  0x12   :  { %275 = vmatpush.bf16.msra.mxu1 %v2050_v42 }
  0x13   :  { %566 = vmatpush.bf16.msrb.mxu0 %v2036_v39 }
  0x15   :  { %336 = vmatpush.bf16.msra.mxu2 %v2025_v37 }
  0x16   :  { %276 = vmatpush.bf16.msra.mxu1 %v2059_v44 }
  0x19   :  { %1608 = vmatmul.msk.bf16.vlgmr.msrb.gmra.mxu1 %vm94_vm0, %v111_v43  ;;  %337 = vmatpush.bf16.msra.mxu2 %v2036_v39 }
  0x1a   :  { %435 = vmatpush.bf16.msrb.mxu1 %v1982_v1 }
  0x1e   :  { %436 = vmatpush.bf16.msrb.mxu1 %v1994_v3 }
  0x86   :  { %v107_v8 = vpop.f32.mrf.mxu1 }
  0x8d   :  { %v190_v9 = vpop.f32.mrf.mxu3 }
  0x8e   :  { %v191_v11 = vadd.f32 %v190_v9, %v107_v8  ;;  %v109_v12 = vpop.f32.mrf.mxu1 }
  0x8f   :  { %v2083_v51 = vpop.f32.mrf.mxu2 }
  0x90   :  { %v195_v13 = vadd.f32 %v194_v10, %v191_v11 }
  0x92   :  { %1726 = vtanh.f32 %v195_v13  ;;  %v1627_v17 = vmul.f32 -1.442695, %v195_v13 }
  0x94   :  { %1728 = vpow2.f32 %v1627_v17 }
  0x95   :  { %v192_v14 = vpop.f32.mrf.mxu3 }
  0x96   :  { %v136_v50 = vpop.f32.mrf.mxu1 }
  0x97   :  { %v167_v53 = vpop.f32.mrf.mxu2  ;;  %v137_v55 = vadd.f32 %v136_v50, %v2088_v54 }
  0x98   :  { %v1727_v15 = vpop.eup %1726 }
  0x99   :  { %222 = vrot.lane.b32.xlu0 %v1727_v15, %s1902_s21 }
  0x9a   :  { %v1729_v18 = vpop.eup %1728 }
  0x9b   :  { %v199_v19 = vadd.f32 1.0, %v1729_v18 }
  0x9d   :  { %1730 = vrcp.f32 %v199_v19  ;;  %v211_v25 = vand.u32 2147483648, %v199_v19  ;;  %vm205_vm2 = vweird.f32 %v199_v19  ;;  %v209_v26 = vand.u32 2147483647, %v199_v19 }
  0x9e   :  { %v138_v52 = vpop.f32.mrf.mxu1 }
  0x9f   :  { %v212_v28 = vor.u32 1.1754944e-38, %v211_v25  ;;  %vm210_vm4 = vcmp.eq.f32.partialorder %v209_v26, 8.507059e+37 }
  0xa1   :  { %217 = vrot.lane.b32.xlu0 %v76_v16, %s1903_s24 }
  0xa3   :  { %v1731_v20 = vpop.eup %1730 }
  0xa4   :  { %v201_v21 = vmul.f32 %v1731_v20, %v199_v19  ;;  %vm206_vm1 = vweird.f32 %v1731_v20 }
  0xa5   :  { %vm207_vm3 = vmor %vm205_vm2, %vm206_vm1 }
  0xa6   :  { %v202_v22 = vsub.f32 1.0, %v201_v21 }
  0xa8   :  { %v203_v23 = vmul.f32 %v1731_v20, %v202_v22  ;;  %v2102_v22 = vld [vmem:[%s2504_s7 + $0x8] sm:$0xff] }
  0xa9   :  { %303 = vrot.lane.b32.xlu0 %v1589_v48, %s1903_s24  ;;  %361 = vmatpush.bf16.msrb.mxu3 %v2102_v22 }
  0xaa   :  { %v204_v24 = vadd.f32 %v1731_v20, %v203_v23  ;;  %v2108_v23 = vld [vmem:[%s2504_s7] sm:$0xff] }
  0xac   :  { %v208_v27 = vsel %vm207_vm3, %v1731_v20, %v204_v24 }
  0xad   :  { %v213_v30 = vsel %vm210_vm4, %v212_v28, %v208_v27  ;;  %362 = vmatpush.bf16.msrb.mxu3 %v2108_v23  ;;  %v1590_v27 = vld [vmem:[%s2499_s2 + $0x10] sm:$0xff] }
  0xb1   :  { %508 = vmatpush.bf16.msra.mxu3 %v2050_v42 }
  0xb5   :  { %509 = vmatpush.bf16.msra.mxu3 %v2059_v44 }
 0x10b   :  { %v223_v29 = vpop.permute.xlu0 %222 }
 0x10c   :  { %v225_v31 = vmul.f32 %v223_v29, %v213_v30  ;;  %v2129_v29 = vld [vmem:[%s2505_s10] sm:$0xff] }
 0x10e   :  { %227 = vrot.lane.b32.xlu1 %v225_v31, %s1903_s24 }
 0x113   :  { %v218_v32 = vpop.permute.xlu0 %217 }
 0x114   :  { %v220_v33 = vmul.f32 %v218_v32, %v213_v30 }
 0x11b   :  { %v304_v17 = vpop.permute.xlu0 %303 }
 0x180   :  { %v228_v34 = vpop.permute.xlu1 %227 }
 0x181   :  { %v2018_v35 = vadd.f32 %v228_v34, %v220_v33 }
 0x183   :  { %1732 = vtanh.f32 %v2018_v35 }
 0x189   :  { %v1733_v36 = vpop.eup %1732 }
 0x18a   :  { %233 = vrot.lane.b32.xlu1 %v1733_v36, %s1902_s21 }
 0x1fc   :  { %v234_v45 = vpop.permute.xlu1 %233 }
 0x1fd   :  { %v236_v46 = vmul.f32 %v234_v45, %v213_v30  ;;  %v166_v30 = vadd.f32 %v2083_v51, %v2129_v29 }
 0x1ff   :  { %v237_v47 = vpack.c.bf16 %v236_v46, %v236_v46 }
 0x201   :  { %239 = vrot.lane.b32.xlu2 %v237_v47, %s1903_s24 }
 0x25b   :  { %v240_v49 = vpop.permute.xlu2 %239 }
 0x25c   :  { %1628 = vmatmul.msk.bf16.vlgmr.msrb.gmra.mxu2 %vm94_vm0, %v240_v49  ;;  %1637 = vmatmul.msk.bf16.vlgmr.msra.gmra.mxu1 %vm94_vm0, %v240_v49 }
 0x25d   :  { %495 = vmatpush.bf16.msrb.mxu2 %v1977_v0  ;;  %578 = vmatpush.bf16.msra.mxu1 %v2102_v22 }
 0x261   :  { %496 = vmatpush.bf16.msrb.mxu2 %v1987_v2  ;;  %579 = vmatpush.bf16.msra.mxu1 %v2108_v23 }
 0x2d9   :  { %v278_v56 = vpop.f32.mrf.mxu1 }
 0x2da   :  { %v279_v57 = vadd.f32 %v278_v56, %v137_v55 }
 0x2dc   :  { %1734 = vtanh.f32 %v279_v57  ;;  %v1638_v62 = vmul.f32 -1.442695, %v279_v57 }
 0x2de   :  { %1736 = vpow2.f32 %v1638_v62 }
 0x2df   :  { %v2091_v58 = vpop.f32.mrf.mxu2 }
 0x2e1   :  { %v280_v59 = vpop.f32.mrf.mxu1 }
 0x2e2   :  { %v1735_v60 = vpop.eup %1734 }
 0x2e3   :  { %308 = vrot.lane.b32.xlu2 %v1735_v60, %s1902_s21 }
 0x2e4   :  { %v1737_v63 = vpop.eup %1736 }
 0x2e5   :  { %v285_v4 = vadd.f32 1.0, %v1737_v63 }
 0x2e7   :  { %v255_v61 = vpop.f32.mrf.mxu2  ;;  %1738 = vrcp.f32 %v285_v4  ;;  %v297_v10 = vand.u32 2147483648, %v285_v4  ;;  %vm291_vm6 = vweird.f32 %v285_v4  ;;  %v295_v11 = vand.u32 2147483647, %v285_v4 }
 0x2e9   :  { %v298_v13 = vor.u32 1.1754944e-38, %v297_v10  ;;  %vm296_vm8 = vcmp.eq.f32.partialorder %v295_v11, 8.507059e+37 }
 0x2ed   :  { %v1739_v5 = vpop.eup %1738 }
 0x2ee   :  { %v287_v6 = vmul.f32 %v1739_v5, %v285_v4  ;;  %vm292_vm5 = vweird.f32 %v1739_v5 }
 0x2ef   :  { %vm293_vm7 = vmor %vm291_vm6, %vm292_vm5 }
 0x2f0   :  { %v288_v7 = vsub.f32 1.0, %v287_v6 }
 0x2f2   :  { %v289_v8 = vmul.f32 %v1739_v5, %v288_v7 }
 0x2f4   :  { %v290_v9 = vadd.f32 %v1739_v5, %v289_v8 }
 0x2f6   :  { %v294_v12 = vsel %vm293_vm7, %v1739_v5, %v290_v9 }
 0x2f7   :  { %v299_v14 = vsel %vm296_vm8, %v298_v13, %v294_v12  ;;  %v1652_v12 = vld [vmem:[%s2498_s0 + $0x8] sm:$0xff] }
 0x2f8   :  { %v306_v18 = vmul.f32 %v304_v17, %v299_v14 }
 0x33d   :  { %v309_v15 = vpop.permute.xlu2 %308 }
 0x33e   :  { %v311_v16 = vmul.f32 %v309_v15, %v299_v14 }
 0x340   :  { %313 = vrot.lane.b32.xlu1 %v311_v16, %s1903_s24 }
 0x3b2   :  { %v314_v19 = vpop.permute.xlu1 %313 }
 0x3b3   :  { %v2095_v20 = vadd.f32 %v314_v19, %v306_v18 }
 0x3b5   :  { %1740 = vtanh.f32 %v2095_v20 }
 0x3bb   :  { %v1741_v21 = vpop.eup %1740 }
 0x3bc   :  { %319 = vrot.lane.b32.xlu2 %v1741_v21, %s1902_s21 }
 0x3c4   :  { %389 = vrot.lane.b32.xlu2 %v1590_v27, %s1903_s24 }
 0x416   :  { %v320_v24 = vpop.permute.xlu2 %319 }
 0x417   :  { %v322_v25 = vmul.f32 %v320_v24, %v299_v14 }
 0x419   :  { %v323_v26 = vpack.c.bf16 %v322_v25, %v322_v25 }
 0x41b   :  { %325 = vrot.lane.b32.xlu0 %v323_v26, %s1903_s24 }
 0x41e   :  { %v390_v61 = vpop.permute.xlu2 %389 }
 0x48d   :  { %v326_v28 = vpop.permute.xlu0 %325 }
 0x48e   :  { %1639 = vmatmul.msk.bf16.vlgmr.msra.gmra.mxu2 %vm94_vm0, %v326_v28  ;;  %1648 = vmatmul.msk.bf16.vlgmr.msrb.gmra.mxu3 %vm94_vm0, %v326_v28 }
 0x48f   :  { %648 = vmatpush.bf16.msrb.mxu3 %v1982_v1  ;;  %635 = vmatpush.bf16.msra.mxu2 %v2030_v38 }
 0x493   :  { %649 = vmatpush.bf16.msrb.mxu3 %v1994_v3  ;;  %636 = vmatpush.bf16.msra.mxu2 %v2045_v41 }
 0x511   :  { %v2133_v31 = vpop.f32.mrf.mxu2  ;;  %v364_v32 = vpop.f32.mrf.mxu3 }
 0x512   :  { %v365_v33 = vadd.f32 %v364_v32, %v166_v30 }
 0x514   :  { %1742 = vtanh.f32 %v365_v33  ;;  %v1649_v43 = vmul.f32 -1.442695, %v365_v33 }
 0x516   :  { %1744 = vpow2.f32 %v1649_v43 }
 0x519   :  { %v341_v34 = vpop.f32.mrf.mxu2  ;;  %v366_v36 = vpop.f32.mrf.mxu3 }
 0x51a   :  { %v1743_v40 = vpop.eup %1742 }
 0x51b   :  { %394 = vrot.lane.b32.xlu1 %v1743_v40, %s1902_s21 }
 0x51c   :  { %v1745_v45 = vpop.eup %1744 }
 0x51d   :  { %v371_v46 = vadd.f32 1.0, %v1745_v45 }
 0x51f   :  { %1746 = vrcp.f32 %v371_v46  ;;  %v383_v52 = vand.u32 2147483648, %v371_v46  ;;  %vm377_vm10 = vweird.f32 %v371_v46  ;;  %v381_v53 = vand.u32 2147483647, %v371_v46 }
 0x521   :  { %v384_v56 = vor.u32 1.1754944e-38, %v383_v52  ;;  %vm382_vm12 = vcmp.eq.f32.partialorder %v381_v53, 8.507059e+37 }
 0x525   :  { %v1747_v47 = vpop.eup %1746 }
 0x526   :  { %v373_v48 = vmul.f32 %v1747_v47, %v371_v46  ;;  %vm378_vm9 = vweird.f32 %v1747_v47 }
 0x527   :  { %vm379_vm11 = vmor %vm377_vm10, %vm378_vm9 }
 0x528   :  { %v374_v49 = vsub.f32 1.0, %v373_v48 }
 0x52a   :  { %v375_v50 = vmul.f32 %v1747_v47, %v374_v49 }
 0x52c   :  { %v376_v51 = vadd.f32 %v1747_v47, %v375_v50 }
 0x52e   :  { %v380_v55 = vsel %vm379_vm11, %v1747_v47, %v376_v51 }
 0x52f   :  { %v385_v57 = vsel %vm382_vm12, %v384_v56, %v380_v55 }
 0x530   :  { %v392_v62 = vmul.f32 %v390_v61, %v385_v57 }
 0x58d   :  { %v395_v59 = vpop.permute.xlu1 %394 }
 0x58e   :  { %v397_v60 = vmul.f32 %v395_v59, %v385_v57 }
 0x590   :  { %399 = vrot.lane.b32.xlu0 %v397_v60, %s1903_s24 }
 0x602   :  { %v400_v63 = vpop.permute.xlu0 %399 }
 0x603   :  { %v2137_v4 = vadd.f32 %v400_v63, %v392_v62 }
 0x605   :  { %1748 = vtanh.f32 %v2137_v4 }
 0x60b   :  { %v1749_v5 = vpop.eup %1748 }
 0x60c   :  { %405 = vrot.lane.b32.xlu1 %v1749_v5, %s1902_s21 }
 0x67e   :  { %v406_v6 = vpop.permute.xlu1 %405 }
 0x67f   :  { %v2141_v7 = vmul.f32 %v406_v6, %v385_v57 }
 0x681   :  { %v409_v8 = vpack.c.bf16 %v2141_v7, %v2141_v7 }
 0x683   :  { %411 = vrot.lane.b32.xlu2 %v409_v8, %s1903_s24 }
 0x6dd   :  { %v412_v9 = vpop.permute.xlu2 %411 }
 0x6de   :  { %1650 = vmatmul.msk.bf16.vlgmr.msra.gmra.mxu0 %vm94_vm0, %v412_v9  ;;  %1651 = vmatmul.msk.bf16.vlgmr.msrb.gmra.mxu1 %vm94_vm0, %v412_v9 }
 0x6df   :  { %721 = vmatpush.bf16.msrb.mxu1 %v2050_v42  ;;  %708 = vmatpush.bf16.msra.mxu0 %v1977_v0 }
 0x6e3   :  { %722 = vmatpush.bf16.msrb.mxu1 %v2059_v44  ;;  %709 = vmatpush.bf16.msra.mxu0 %v1987_v2 }
 0x75b   :  { %v2152_v10 = vpop.f32.mrf.mxu0  ;;  %v438_v11 = vpop.f32.mrf.mxu1 }
 0x75c   :  { %v439_v13 = vadd.f32 %v438_v11, %v2091_v58 }
 0x75e   :  { %v444_v14 = vadd.f32 %v1652_v12, %v439_v13 }
 0x760   :  { %1750 = vtanh.f32 %v444_v14  ;;  %v1653_v18 = vmul.f32 -1.442695, %v444_v14 }
 0x762   :  { %1752 = vpow2.f32 %v1653_v18 }
 0x763   :  { %v427_v15 = vpop.f32.mrf.mxu0  ;;  %v440_v16 = vpop.f32.mrf.mxu1 }
 0x766   :  { %v1751_v17 = vpop.eup %1750 }
 0x767   :  { %467 = vrot.lane.b32.xlu0 %v1751_v17, %s1902_s21 }
 0x768   :  { %v1753_v19 = vpop.eup %1752 }
 0x769   :  { %v448_v21 = vadd.f32 1.0, %v1753_v19 }
 0x76b   :  { %1754 = vrcp.f32 %v448_v21  ;;  %v460_v30 = vand.u32 2147483648, %v448_v21  ;;  %vm454_vm14 = vweird.f32 %v448_v21  ;;  %v458_v58 = vand.u32 2147483647, %v448_v21 }
 0x76d   :  { %v461_v33 = vor.u32 1.1754944e-38, %v460_v30  ;;  %vm459_vm1 = vcmp.eq.f32.partialorder %v458_v58, 8.507059e+37 }
 0x771   :  { %v1755_v24 = vpop.eup %1754 }
 0x772   :  { %v450_v25 = vmul.f32 %v1755_v24, %v448_v21  ;;  %vm455_vm13 = vweird.f32 %v1755_v24 }
 0x773   :  { %vm456_vm15 = vmor %vm454_vm14, %vm455_vm13 }
 0x774   :  { %v451_v26 = vsub.f32 1.0, %v450_v25 }
 0x776   :  { %v452_v27 = vmul.f32 %v1755_v24, %v451_v26 }
 0x778   :  { %v453_v28 = vadd.f32 %v1755_v24, %v452_v27 }
 0x77a   :  { %v457_v32 = vsel %vm456_vm15, %v1755_v24, %v453_v28 }
 0x77b   :  { %v462_v36 = vsel %vm459_vm1, %v461_v33, %v457_v32 }
 0x77c   :  { %v465_v43 = vmul.f32 %v462_v36, %v2018_v35  ;;  %v340_v35 = vadd.f32 %v2133_v31, %v2088_v54 }
 0x7d9   :  { %v468_v34 = vpop.permute.xlu0 %467 }
 0x7da   :  { %v470_v40 = vmul.f32 %v468_v34, %v462_v36 }
 0x7dc   :  { %472 = vrot.lane.b32.xlu1 %v470_v40, %s1903_s24 }
 0x84e   :  { %v473_v45 = vpop.permute.xlu1 %472 }
 0x84f   :  { %v2161_v46 = vadd.f32 %v473_v45, %v465_v43 }
 0x851   :  { %1756 = vtanh.f32 %v2161_v46 }
 0x857   :  { %v1757_v47 = vpop.eup %1756 }
 0x858   :  { %478 = vrot.lane.b32.xlu2 %v1757_v47, %s1902_s21 }
 0x8b2   :  { %v479_v48 = vpop.permute.xlu2 %478 }
 0x8b3   :  { %v481_v49 = vmul.f32 %v479_v48, %v462_v36 }
 0x8b5   :  { %v482_v50 = vpack.c.bf16 %v481_v49, %v481_v49 }
 0x8b7   :  { %484 = vrot.lane.b32.xlu0 %v482_v50, %s1903_s24 }
 0x929   :  { %v485_v51 = vpop.permute.xlu0 %484 }
 0x92a   :  { %1654 = vmatmul.msk.bf16.vlgmr.msrb.gmra.mxu2 %vm94_vm0, %v485_v51  ;;  %1655 = vmatmul.msk.bf16.vlgmr.msra.gmra.mxu3 %vm94_vm0, %v485_v51 }
 0x92b   :  { %791 = vmatpush.bf16.msra.mxu3 %v2102_v22  ;;  %778 = vmatpush.bf16.msrb.mxu2 %v2025_v37 }
 0x92f   :  { %792 = vmatpush.bf16.msra.mxu3 %v2108_v23  ;;  %779 = vmatpush.bf16.msrb.mxu2 %v2036_v39 }
 0x9ad   :  { %v2174_v52 = vpop.f32.mrf.mxu2  ;;  %v511_v53 = vpop.f32.mrf.mxu3 }
 0x9ae   :  { %v512_v55 = vadd.f32 %v511_v53, %v340_v35 }
 0x9b0   :  { %1758 = vtanh.f32 %v512_v55  ;;  %v1656_v60 = vmul.f32 -1.442695, %v512_v55 }
 0x9b2   :  { %1760 = vpow2.f32 %v1656_v60 }
 0x9b5   :  { %v500_v56 = vpop.f32.mrf.mxu2  ;;  %v513_v57 = vpop.f32.mrf.mxu3 }
 0x9b6   :  { %v1759_v59 = vpop.eup %1758 }
 0x9b7   :  { %537 = vrot.lane.b32.xlu1 %v1759_v59, %s1902_s21 }
 0x9b8   :  { %v1761_v61 = vpop.eup %1760 }
 0x9b9   :  { %v518_v62 = vadd.f32 1.0, %v1761_v61 }
 0x9bb   :  { %1762 = vrcp.f32 %v518_v62  ;;  %v530_v9 = vand.u32 2147483648, %v518_v62  ;;  %vm524_vm3 = vweird.f32 %v518_v62  ;;  %v528_v11 = vand.u32 2147483647, %v518_v62 }
 0x9bd   :  { %v531_v13 = vor.u32 1.1754944e-38, %v530_v9  ;;  %vm529_vm5 = vcmp.eq.f32.partialorder %v528_v11, 8.507059e+37  ;;  %v1662_v9 = vld [vmem:[%s2498_s0 + $0x10] sm:$0xff] }
 0x9c1   :  { %v1763_v63 = vpop.eup %1762 }
 0x9c2   :  { %v520_v5 = vmul.f32 %v1763_v63, %v518_v62  ;;  %vm525_vm2 = vweird.f32 %v1763_v63 }
 0x9c3   :  { %vm526_vm4 = vmor %vm524_vm3, %vm525_vm2 }
 0x9c4   :  { %v521_v6 = vsub.f32 1.0, %v520_v5 }
 0x9c6   :  { %v522_v8 = vmul.f32 %v1763_v63, %v521_v6 }
 0x9c8   :  { %v523_v31 = vadd.f32 %v1763_v63, %v522_v8 }
 0x9ca   :  { %v527_v12 = vsel %vm526_vm4, %v1763_v63, %v523_v31 }
 0x9cb   :  { %v532_v15 = vsel %vm529_vm5, %v531_v13, %v527_v12 }
 0x9cc   :  { %v535_v17 = vmul.f32 %v532_v15, %v2095_v20  ;;  %v426_v20 = vadd.f32 %v2152_v10, %v2129_v29 }
 0xa29   :  { %v538_v14 = vpop.permute.xlu1 %537 }
 0xa2a   :  { %v540_v16 = vmul.f32 %v538_v14, %v532_v15 }
 0xa2c   :  { %542 = vrot.lane.b32.xlu2 %v540_v16, %s1903_s24 }
 0xa86   :  { %v543_v18 = vpop.permute.xlu2 %542 }
 0xa87   :  { %v2179_v19 = vadd.f32 %v543_v18, %v535_v17 }
 0xa89   :  { %1764 = vtanh.f32 %v2179_v19 }
 0xa8f   :  { %v1765_v21 = vpop.eup %1764 }
 0xa90   :  { %548 = vrot.lane.b32.xlu0 %v1765_v21, %s1902_s21 }
 0xb02   :  { %v549_v24 = vpop.permute.xlu0 %548 }
 0xb03   :  { %v551_v25 = vmul.f32 %v549_v24, %v532_v15 }
 0xb05   :  { %v552_v26 = vpack.c.bf16 %v551_v25, %v551_v25 }
 0xb07   :  { %554 = vrot.lane.b32.xlu1 %v552_v26, %s1903_s24 }
 0xb79   :  { %v555_v27 = vpop.permute.xlu1 %554 }
 0xb7a   :  { %1657 = vmatmul.msk.bf16.vlgmr.msrb.gmra.mxu0 %vm94_vm0, %v555_v27  ;;  %1658 = vmatmul.msk.bf16.vlgmr.msra.gmra.mxu1 %vm94_vm0, %v555_v27 }
 0xb7b   :  { %861 = vmatpush.bf16.msra.mxu1 %v1982_v1  ;;  %848 = vmatpush.bf16.msrb.mxu0 %v2030_v38 }
 0xb7f   :  { %862 = vmatpush.bf16.msra.mxu1 %v1994_v3  ;;  %849 = vmatpush.bf16.msrb.mxu0 %v2045_v41 }
 0xbf7   :  { %v2192_v28 = vpop.f32.mrf.mxu0  ;;  %v581_v30 = vpop.f32.mrf.mxu1 }
 0xbf8   :  { %v582_v58 = vadd.f32 %v581_v30, %v426_v20 }
 0xbfa   :  { %1766 = vtanh.f32 %v582_v58  ;;  %v1659_v36 = vmul.f32 -1.442695, %v582_v58 }
 0xbfc   :  { %1768 = vpow2.f32 %v1659_v36 }
 0xbff   :  { %v570_v32 = vpop.f32.mrf.mxu0  ;;  %v583_v33 = vpop.f32.mrf.mxu1 }
 0xc00   :  { %v1767_v34 = vpop.eup %1766 }
 0xc01   :  { %607 = vrot.lane.b32.xlu2 %v1767_v34, %s1902_s21 }
 0xc02   :  { %v1769_v40 = vpop.eup %1768 }
 0xc03   :  { %v588_v43 = vadd.f32 1.0, %v1769_v40 }
 0xc05   :  { %1770 = vrcp.f32 %v588_v43  ;;  %v600_v50 = vand.u32 2147483648, %v588_v43  ;;  %vm594_vm7 = vweird.f32 %v588_v43  ;;  %v598_v51 = vand.u32 2147483647, %v588_v43 }
 0xc07   :  { %v601_v53 = vor.u32 1.1754944e-38, %v600_v50  ;;  %vm599_vm9 = vcmp.eq.f32.partialorder %v598_v51, 8.507059e+37 }
 0xc0b   :  { %v1771_v45 = vpop.eup %1770 }
 0xc0c   :  { %v590_v47 = vmul.f32 %v1771_v45, %v588_v43  ;;  %vm595_vm6 = vweird.f32 %v1771_v45 }
 0xc0d   :  { %vm596_vm8 = vmor %vm594_vm7, %vm595_vm6 }
 0xc0e   :  { %v591_v48 = vsub.f32 1.0, %v590_v47 }
 0xc10   :  { %v592_v49 = vmul.f32 %v1771_v45, %v591_v48 }
 0xc12   :  { %v593_v10 = vadd.f32 %v1771_v45, %v592_v49 }
 0xc14   :  { %v597_v35 = vsel %vm596_vm8, %v1771_v45, %v593_v10 }
 0xc15   :  { %v602_v56 = vsel %vm599_vm9, %v601_v53, %v597_v35 }
 0xc16   :  { %v605_v59 = vmul.f32 %v602_v56, %v2137_v4 }
 0xc5b   :  { %v608_v55 = vpop.permute.xlu2 %607 }
 0xc5c   :  { %v610_v57 = vmul.f32 %v608_v55, %v602_v56 }
 0xc5e   :  { %612 = vrot.lane.b32.xlu0 %v610_v57, %s1903_s24 }
 0xcd0   :  { %v613_v60 = vpop.permute.xlu0 %612 }
 0xcd1   :  { %v2197_v61 = vadd.f32 %v613_v60, %v605_v59 }
 0xcd3   :  { %1772 = vtanh.f32 %v2197_v61 }
 0xcd9   :  { %v1773_v62 = vpop.eup %1772 }
 0xcda   :  { %618 = vrot.lane.b32.xlu1 %v1773_v62, %s1902_s21 }
 0xd4c   :  { %v619_v63 = vpop.permute.xlu1 %618 }
 0xd4d   :  { %v2201_v5 = vmul.f32 %v619_v63, %v602_v56 }
 0xd4f   :  { %v622_v6 = vpack.c.bf16 %v2201_v5, %v2201_v5 }
 0xd51   :  { %624 = vrot.lane.b32.xlu2 %v622_v6, %s1903_s24 }
 0xdab   :  { %v625_v8 = vpop.permute.xlu2 %624 }
 0xdac   :  { %1660 = vmatmul.msk.bf16.vlgmr.msra.gmra.mxu2 %vm94_vm0, %v625_v8  ;;  %1661 = vmatmul.msk.bf16.vlgmr.msrb.gmra.mxu3 %vm94_vm0, %v625_v8 }
 0xdad   :  { %934 = vmatpush.bf16.msrb.mxu3 %v2050_v42  ;;  %921 = vmatpush.bf16.msra.mxu2 %v1977_v0 }
 0xdb1   :  { %935 = vmatpush.bf16.msrb.mxu3 %v2059_v44  ;;  %922 = vmatpush.bf16.msra.mxu2 %v1987_v2 }
 0xe2f   :  { %v2212_v4 = vpop.f32.mrf.mxu2  ;;  %v651_v31 = vpop.f32.mrf.mxu3 }
 0xe30   :  { %v652_v11 = vadd.f32 %v651_v31, %v2174_v52 }
 0xe32   :  { %v657_v12 = vadd.f32 %v1662_v9, %v652_v11 }
 0xe34   :  { %1774 = vtanh.f32 %v657_v12  ;;  %v1663_v16 = vmul.f32 -1.442695, %v657_v12 }
 0xe36   :  { %1776 = vpow2.f32 %v1663_v16 }
 0xe37   :  { %v640_v13 = vpop.f32.mrf.mxu2  ;;  %v653_v14 = vpop.f32.mrf.mxu3 }
 0xe3a   :  { %v1775_v15 = vpop.eup %1774 }
 0xe3b   :  { %680 = vrot.lane.b32.xlu0 %v1775_v15, %s1902_s21 }
 0xe3c   :  { %v1777_v17 = vpop.eup %1776 }
 0xe3d   :  { %v661_v18 = vadd.f32 1.0, %v1777_v17 }
 0xe3f   :  { %1778 = vrcp.f32 %v661_v18  ;;  %v673_v20 = vand.u32 2147483648, %v661_v18  ;;  %vm667_vm11 = vweird.f32 %v661_v18  ;;  %v671_v52 = vand.u32 2147483647, %v661_v18 }
 0xe41   :  { %v674_v58 = vor.u32 1.1754944e-38, %v673_v20  ;;  %vm672_vm13 = vcmp.eq.f32.partialorder %v671_v52, 8.507059e+37 }
 0xe45   :  { %v1779_v21 = vpop.eup %1778 }
 0xe46   :  { %v663_v24 = vmul.f32 %v1779_v21, %v661_v18  ;;  %vm668_vm10 = vweird.f32 %v1779_v21 }
 0xe47   :  { %vm669_vm12 = vmor %vm667_vm11, %vm668_vm10 }
 0xe48   :  { %v664_v25 = vsub.f32 1.0, %v663_v24 }
 0xe4a   :  { %v665_v26 = vmul.f32 %v1779_v21, %v664_v25 }
 0xe4c   :  { %v666_v27 = vadd.f32 %v1779_v21, %v665_v26 }
 0xe4e   :  { %v670_v30 = vsel %vm669_vm12, %v1779_v21, %v666_v27 }
 0xe4f   :  { %v675_v33 = vsel %vm672_vm13, %v674_v58, %v670_v30 }
 0xe50   :  { %v678_v36 = vmul.f32 %v675_v33, %v2161_v46  ;;  %v569_v46 = vadd.f32 %v2192_v28, %v2088_v54 }
 0xead   :  { %v681_v32 = vpop.permute.xlu0 %680 }
 0xeae   :  { %v683_v34 = vmul.f32 %v681_v32, %v675_v33 }
 0xeb0   :  { %685 = vrot.lane.b32.xlu1 %v683_v34, %s1903_s24 }
 0xf22   :  { %v686_v40 = vpop.permute.xlu1 %685 }
 0xf23   :  { %v2221_v43 = vadd.f32 %v686_v40, %v678_v36 }
 0xf25   :  { %1780 = vtanh.f32 %v2221_v43 }
 0xf2b   :  { %v1781_v45 = vpop.eup %1780 }
 0xf2c   :  { %691 = vrot.lane.b32.xlu2 %v1781_v45, %s1902_s21 }
 0xf86   :  { %v692_v47 = vpop.permute.xlu2 %691 }
 0xf87   :  { %v694_v48 = vmul.f32 %v692_v47, %v675_v33 }
 0xf89   :  { %v695_v49 = vpack.c.bf16 %v694_v48, %v694_v48 }
 0xf8b   :  { %697 = vrot.lane.b32.xlu0 %v695_v49, %s1903_s24 }
 0xffd   :  { %v698_v10 = vpop.permute.xlu0 %697 }
 0xffe   :  { %1664 = vmatmul.msk.bf16.vlgmr.msra.gmra.mxu0 %vm94_vm0, %v698_v10  ;;  %1665 = vmatmul.msk.bf16.vlgmr.msrb.gmra.mxu1 %vm94_vm0, %v698_v10 }
 0xfff   :  { %1004 = vmatpush.bf16.msrb.mxu1 %v2102_v22  ;;  %991 = vmatpush.bf16.msra.mxu0 %v2025_v37 }
0x1003   :  { %1005 = vmatpush.bf16.msrb.mxu1 %v2108_v23  ;;  %992 = vmatpush.bf16.msra.mxu0 %v2036_v39 }
0x107b   :  { %v2234_v50 = vpop.f32.mrf.mxu0  ;;  %v724_v51 = vpop.f32.mrf.mxu1 }
0x107c   :  { %v725_v35 = vadd.f32 %v724_v51, %v569_v46 }
0x107e   :  { %1782 = vtanh.f32 %v725_v35  ;;  %v1666_v57 = vmul.f32 -1.442695, %v725_v35 }
0x1080   :  { %1784 = vpow2.f32 %v1666_v57 }
0x1083   :  { %v713_v53 = vpop.f32.mrf.mxu0  ;;  %v726_v55 = vpop.f32.mrf.mxu1 }
0x1084   :  { %v1783_v56 = vpop.eup %1782 }
0x1085   :  { %750 = vrot.lane.b32.xlu1 %v1783_v56, %s1902_s21 }
0x1086   :  { %v1785_v59 = vpop.eup %1784 }
0x1087   :  { %v731_v60 = vadd.f32 1.0, %v1785_v59 }
0x1089   :  { %1786 = vrcp.f32 %v731_v60  ;;  %v743_v31 = vand.u32 2147483648, %v731_v60  ;;  %vm737_vm15 = vweird.f32 %v731_v60  ;;  %v741_v9 = vand.u32 2147483647, %v731_v60 }
0x108b   :  { %v744_v12 = vor.u32 1.1754944e-38, %v743_v31  ;;  %vm742_vm2 = vcmp.eq.f32.partialorder %v741_v9, 8.507059e+37 }
0x108f   :  { %v1787_v62 = vpop.eup %1786 }
0x1090   :  { %v733_v63 = vmul.f32 %v1787_v62, %v731_v60  ;;  %vm738_vm14 = vweird.f32 %v1787_v62 }
0x1091   :  { %vm739_vm1 = vmor %vm737_vm15, %vm738_vm14 }
0x1092   :  { %v734_v6 = vsub.f32 1.0, %v733_v63 }
0x1094   :  { %v735_v8 = vmul.f32 %v1787_v62, %v734_v6  ;;  %v1672_v6 = vld [vmem:[%s2498_s0 + $0x18] sm:$0xff] }
0x1096   :  { %v736_v28 = vadd.f32 %v1787_v62, %v735_v8 }
0x1098   :  { %v740_v11 = vsel %vm739_vm1, %v1787_v62, %v736_v28 }
0x1099   :  { %v745_v14 = vsel %vm742_vm2, %v744_v12, %v740_v11 }
0x109a   :  { %v748_v16 = vmul.f32 %v745_v14, %v2179_v19  ;;  %v639_v19 = vadd.f32 %v2212_v4, %v2129_v29 }
0x10f7   :  { %v751_v13 = vpop.permute.xlu1 %750 }
0x10f8   :  { %v753_v15 = vmul.f32 %v751_v13, %v745_v14 }
0x10fa   :  { %755 = vrot.lane.b32.xlu2 %v753_v15, %s1903_s24 }
0x1154   :  { %v756_v17 = vpop.permute.xlu2 %755 }
0x1155   :  { %v2239_v18 = vadd.f32 %v756_v17, %v748_v16 }
0x1157   :  { %1788 = vtanh.f32 %v2239_v18 }
0x115d   :  { %v1789_v21 = vpop.eup %1788 }
0x115e   :  { %761 = vrot.lane.b32.xlu0 %v1789_v21, %s1902_s21 }
0x11d0   :  { %v762_v24 = vpop.permute.xlu0 %761 }
0x11d1   :  { %v764_v25 = vmul.f32 %v762_v24, %v745_v14 }
0x11d3   :  { %v765_v26 = vpack.c.bf16 %v764_v25, %v764_v25 }
0x11d5   :  { %767 = vrot.lane.b32.xlu1 %v765_v26, %s1903_s24 }
0x1247   :  { %v768_v27 = vpop.permute.xlu1 %767 }
0x1248   :  { %1667 = vmatmul.msk.bf16.vlgmr.msrb.gmra.mxu2 %vm94_vm0, %v768_v27  ;;  %1668 = vmatmul.msk.bf16.vlgmr.msra.gmra.mxu3 %vm94_vm0, %v768_v27 }
0x1249   :  { %1074 = vmatpush.bf16.msra.mxu3 %v1982_v1  ;;  %1061 = vmatpush.bf16.msrb.mxu2 %v2030_v38 }
0x124d   :  { %1075 = vmatpush.bf16.msra.mxu3 %v1994_v3  ;;  %1062 = vmatpush.bf16.msrb.mxu2 %v2045_v41 }
0x12cb   :  { %v2252_v20 = vpop.f32.mrf.mxu2  ;;  %v794_v52 = vpop.f32.mrf.mxu3 }
0x12cc   :  { %v795_v30 = vadd.f32 %v794_v52, %v639_v19 }
0x12ce   :  { %1790 = vtanh.f32 %v795_v30  ;;  %v1669_v1 = vmul.f32 -1.442695, %v795_v30 }
0x12d0   :  { %1792 = vpow2.f32 %v1669_v1 }
0x12d3   :  { %v783_v58 = vpop.f32.mrf.mxu2  ;;  %v796_v32 = vpop.f32.mrf.mxu3 }
0x12d4   :  { %v1791_v33 = vpop.eup %1790 }
0x12d5   :  { %820 = vrot.lane.b32.xlu2 %v1791_v33, %s1902_s21 }
0x12d6   :  { %v1793_v38 = vpop.eup %1792 }
0x12d7   :  { %v801_v34 = vadd.f32 1.0, %v1793_v38 }
0x12d9   :  { %1794 = vrcp.f32 %v801_v34  ;;  %v813_v45 = vand.u32 2147483648, %v801_v34  ;;  %vm807_vm4 = vweird.f32 %v801_v34  ;;  %v811_v47 = vand.u32 2147483647, %v801_v34 }
0x12db   :  { %v814_v49 = vor.u32 1.1754944e-38, %v813_v45  ;;  %vm812_vm6 = vcmp.eq.f32.partialorder %v811_v47, 8.507059e+37 }
0x12df   :  { %v1795_v3 = vpop.eup %1794 }
0x12e0   :  { %v803_v41 = vmul.f32 %v1795_v3, %v801_v34  ;;  %vm808_vm3 = vweird.f32 %v1795_v3 }
0x12e1   :  { %vm809_vm5 = vmor %vm807_vm4, %vm808_vm3 }
0x12e2   :  { %v804_v36 = vsub.f32 1.0, %v803_v41 }
0x12e4   :  { %v805_v40 = vmul.f32 %v1795_v3, %v804_v36 }
0x12e6   :  { %v806_v4 = vadd.f32 %v1795_v3, %v805_v40 }
0x12e8   :  { %v810_v48 = vsel %vm809_vm5, %v1795_v3, %v806_v4 }
0x12e9   :  { %v815_v46 = vsel %vm812_vm6, %v814_v49, %v810_v48 }
0x12ea   :  { %v818_v35 = vmul.f32 %v815_v46, %v2197_v61 }
0x132f   :  { %v821_v10 = vpop.permute.xlu2 %820 }
0x1330   :  { %v823_v51 = vmul.f32 %v821_v10, %v815_v46 }
0x1332   :  { %825 = vrot.lane.b32.xlu0 %v823_v51, %s1903_s24 }
0x13a4   :  { %v826_v53 = vpop.permute.xlu0 %825 }
0x13a5   :  { %v2257_v55 = vadd.f32 %v826_v53, %v818_v35 }
0x13a7   :  { %1796 = vtanh.f32 %v2257_v55 }
0x13ad   :  { %v1797_v56 = vpop.eup %1796 }
0x13ae   :  { %831 = vrot.lane.b32.xlu1 %v1797_v56, %s1902_s21 }
0x1420   :  { %v832_v57 = vpop.permute.xlu1 %831 }
0x1421   :  { %v2261_v59 = vmul.f32 %v832_v57, %v815_v46 }
0x1423   :  { %v835_v60 = vpack.c.bf16 %v2261_v59, %v2261_v59 }
0x1425   :  { %837 = vrot.lane.b32.xlu2 %v835_v60, %s1903_s24 }
0x147f   :  { %v838_v62 = vpop.permute.xlu2 %837 }
0x1480   :  { %1670 = vmatmul.msk.bf16.vlgmr.msrb.gmra.mxu0 %vm94_vm0, %v838_v62  ;;  %1671 = vmatmul.msk.bf16.vlgmr.msra.gmra.mxu1 %vm94_vm0, %v838_v62 }
0x1481   :  { %1147 = vmatpush.bf16.msra.mxu1 %v2050_v42  ;;  %1134 = vmatpush.bf16.msrb.mxu0 %v1977_v0 }
0x1485   :  { %1148 = vmatpush.bf16.msra.mxu1 %v2059_v44  ;;  %1135 = vmatpush.bf16.msrb.mxu0 %v1987_v2 }
0x14fd   :  { %v2272_v61 = vpop.f32.mrf.mxu0  ;;  %v864_v63 = vpop.f32.mrf.mxu1 }
0x14fe   :  { %v865_v8 = vadd.f32 %v864_v63, %v2234_v50 }
0x1500   :  { %v870_v28 = vadd.f32 %v1672_v6, %v865_v8 }
0x1502   :  { %1798 = vtanh.f32 %v870_v28  ;;  %v1673_v0 = vmul.f32 -1.442695, %v870_v28 }
0x1504   :  { %1800 = vpow2.f32 %v1673_v0  ;;  %v1897_v0 = vld [vmem:[%s2501_s8] sm:$0xff] }
0x1505   :  { %v853_v31 = vpop.f32.mrf.mxu0  ;;  %v866_v9 = vpop.f32.mrf.mxu1 }
0x1506   :  { %v1895_v9 = vld [vmem:[%s2501_s8 + $0x8] sm:$0xff] }
0x1508   :  { %v1799_v42 = vpop.eup %1798 }
0x1509   :  { %893 = vrot.lane.b32.xlu0 %v1799_v42, %s1902_s21  ;;  %v1896_v42 = vld [vmem:[%s2496_s3] sm:$0xff] }
0x150a   :  { %v1801_v44 = vpop.eup %1800 }
0x150b   :  { %v874_v2 = vadd.f32 1.0, %v1801_v44  ;;  %v852_v44 = vadd.f32 %v2272_v61, %v2129_v29 }
0x150d   :  { %1802 = vrcp.f32 %v874_v2  ;;  %v886_v16 = vand.u32 2147483648, %v874_v2  ;;  %vm880_vm8 = vweird.f32 %v874_v2  ;;  %v884_v50 = vand.u32 2147483647, %v874_v2 }
0x150f   :  { %v887_v21 = vor.u32 1.1754944e-38, %v886_v16  ;;  %vm885_vm10 = vcmp.eq.f32.partialorder %v884_v50, 8.507059e+37 }
0x1513   :  { %v1803_v11 = vpop.eup %1802 }
0x1514   :  { %v876_v12 = vmul.f32 %v1803_v11, %v874_v2  ;;  %vm881_vm7 = vweird.f32 %v1803_v11 }
0x1515   :  { %vm882_vm9 = vmor %vm880_vm8, %vm881_vm7 }
0x1516   :  { %v877_v13 = vsub.f32 1.0, %v876_v12 }
0x1518   :  { %v878_v14 = vmul.f32 %v1803_v11, %v877_v13 }
0x151a   :  { %v879_v15 = vadd.f32 %v1803_v11, %v878_v14 }
0x151c   :  { %v883_v17 = vsel %vm882_vm9, %v1803_v11, %v879_v15 }
0x151d   :  { %v888_v25 = vsel %vm885_vm10, %v887_v21, %v883_v17 }
0x151e   :  { %v891_v27 = vmul.f32 %v888_v25, %v2221_v43  ;;  %v782_v43 = vadd.f32 %v2252_v20, %v2088_v54 }
0x157b   :  { %v894_v24 = vpop.permute.xlu0 %893 }
0x157c   :  { %v896_v26 = vmul.f32 %v894_v24, %v888_v25 }
0x157e   :  { %898 = vrot.lane.b32.xlu1 %v896_v26, %s1903_s24 }
0x15f0   :  { %v899_v19 = vpop.permute.xlu1 %898 }
0x15f1   :  { %v2281_v52 = vadd.f32 %v899_v19, %v891_v27 }
0x15f3   :  { %1804 = vtanh.f32 %v2281_v52 }
0x15f9   :  { %v1805_v30 = vpop.eup %1804 }
0x15fa   :  { %904 = vrot.lane.b32.xlu2 %v1805_v30, %s1902_s21 }
0x1654   :  { %v905_v58 = vpop.permute.xlu2 %904 }
0x1655   :  { %v907_v32 = vmul.f32 %v905_v58, %v888_v25 }
0x1657   :  { %v908_v33 = vpack.c.bf16 %v907_v32, %v907_v32 }
0x1659   :  { %910 = vrot.lane.b32.xlu0 %v908_v33, %s1903_s24 }
0x16cb   :  { %v911_v1 = vpop.permute.xlu0 %910 }
0x16cc   :  { %1674 = vmatmul.msk.bf16.vlgmr.msra.gmra.mxu2 %vm94_vm0, %v911_v1  ;;  %1675 = vmatmul.msk.bf16.vlgmr.msrb.gmra.mxu3 %vm94_vm0, %v911_v1 }
0x16cd   :  { %1217 = vmatpush.bf16.msrb.mxu3 %v2102_v22  ;;  %1204 = vmatpush.bf16.msra.mxu2 %v2025_v37 }
0x16d1   :  { %1218 = vmatpush.bf16.msrb.mxu3 %v2108_v23  ;;  %1205 = vmatpush.bf16.msra.mxu2 %v2036_v39 }
0x174f   :  { %v2294_v38 = vpop.f32.mrf.mxu2  ;;  %v937_v34 = vpop.f32.mrf.mxu3 }
0x1750   :  { %v938_v3 = vadd.f32 %v937_v34, %v782_v43 }
0x1752   :  { %1806 = vtanh.f32 %v938_v3  ;;  %v1676_v4 = vmul.f32 -1.442695, %v938_v3 }
0x1754   :  { %1808 = vpow2.f32 %v1676_v4 }
0x1757   :  { %v926_v41 = vpop.f32.mrf.mxu2  ;;  %v939_v36 = vpop.f32.mrf.mxu3 }
0x1758   :  { %v1807_v40 = vpop.eup %1806 }
0x1759   :  { %963 = vrot.lane.b32.xlu1 %v1807_v40, %s1902_s21 }
0x175a   :  { %v1809_v37 = vpop.eup %1808 }
0x175b   :  { %v944_v45 = vadd.f32 1.0, %v1809_v37  ;;  %v1899_v37 = vld [vmem:[%s2502_s5] sm:$0xff] }
0x175d   :  { %1810 = vrcp.f32 %v944_v45  ;;  %v956_v20 = vand.u32 2147483648, %v944_v45  ;;  %vm950_vm12 = vweird.f32 %v944_v45  ;;  %v954_v10 = vand.u32 2147483647, %v944_v45 }
0x175f   :  { %v957_v51 = vor.u32 1.1754944e-38, %v956_v20  ;;  %vm955_vm14 = vcmp.eq.f32.partialorder %v954_v10, 8.507059e+37 }
0x1763   :  { %v1811_v47 = vpop.eup %1810 }
0x1764   :  { %v946_v39 = vmul.f32 %v1811_v47, %v944_v45  ;;  %vm951_vm11 = vweird.f32 %v1811_v47 }
0x1765   :  { %vm952_vm13 = vmor %vm950_vm12, %vm951_vm11 }
0x1766   :  { %v947_v48 = vsub.f32 1.0, %v946_v39  ;;  %v1682_v39 = vld [vmem:[%s2498_s0 + $0x20] sm:$0xff] }
0x1768   :  { %v948_v49 = vmul.f32 %v1811_v47, %v947_v48 }
0x176a   :  { %v949_v54 = vadd.f32 %v1811_v47, %v948_v49 }
0x176c   :  { %v953_v46 = vsel %vm952_vm13, %v1811_v47, %v949_v54 }
0x176d   :  { %v958_v53 = vsel %vm955_vm14, %v957_v51, %v953_v46 }
0x176e   :  { %v961_v57 = vmul.f32 %v958_v53, %v2239_v18  ;;  %v1894_v18 = vld [vmem:[%s2496_s3 + $0x8] sm:$0xff] }
0x17cb   :  { %v964_v35 = vpop.permute.xlu1 %963 }
0x17cc   :  { %v966_v56 = vmul.f32 %v964_v35, %v958_v53 }
0x17ce   :  { %968 = vrot.lane.b32.xlu2 %v966_v56, %s1903_s24 }
0x1828   :  { %v969_v60 = vpop.permute.xlu2 %968 }
0x1829   :  { %v2299_v62 = vadd.f32 %v969_v60, %v961_v57 }
0x182b   :  { %1812 = vtanh.f32 %v2299_v62 }
0x1831   :  { %v1813_v63 = vpop.eup %1812 }
0x1832   :  { %974 = vrot.lane.b32.xlu0 %v1813_v63, %s1902_s21 }
0x18a4   :  { %v975_v6 = vpop.permute.xlu0 %974 }
0x18a5   :  { %v977_v8 = vmul.f32 %v975_v6, %v958_v53 }
0x18a7   :  { %v978_v28 = vpack.c.bf16 %v977_v8, %v977_v8 }
0x18a9   :  { %980 = vrot.lane.b32.xlu1 %v978_v28, %s1903_s24 }
0x191b   :  { %v981_v31 = vpop.permute.xlu1 %980 }
0x191c   :  { %1677 = vmatmul.msk.bf16.vlgmr.msra.gmra.mxu0 %vm94_vm0, %v981_v31  ;;  %1678 = vmatmul.msk.bf16.vlgmr.msrb.gmra.mxu1 %vm94_vm0, %v981_v31 }
0x191d   :  { %1287 = vmatpush.bf16.msrb.mxu1 %v1894_v18  ;;  %1274 = vmatpush.bf16.msra.mxu0 %v1895_v9 }
0x1921   :  { %1288 = vmatpush.bf16.msrb.mxu1 %v1896_v42  ;;  %1275 = vmatpush.bf16.msra.mxu0 %v1897_v0 }
0x1999   :  { %v2320_v2 = vpop.f32.mrf.mxu0  ;;  %v1007_v11 = vpop.f32.mrf.mxu1 }
0x199a   :  { %v1008_v12 = vadd.f32 %v1007_v11, %v852_v44 }
0x199c   :  { %1814 = vtanh.f32 %v1008_v12  ;;  %v1679_v16 = vmul.f32 -1.442695, %v1008_v12 }
0x199e   :  { %1816 = vpow2.f32 %v1679_v16 }
0x19a1   :  { %v996_v13 = vpop.f32.mrf.mxu0  ;;  %v1009_v14 = vpop.f32.mrf.mxu1 }
0x19a2   :  { %v1815_v15 = vpop.eup %1814 }
0x19a3   :  { %1033 = vrot.lane.b32.xlu2 %v1815_v15, %s1902_s21 }
0x19a4   :  { %v1817_v50 = vpop.eup %1816 }
0x19a5   :  { %v1014_v17 = vadd.f32 1.0, %v1817_v50 }
0x19a7   :  { %1818 = vrcp.f32 %v1014_v17  ;;  %v1026_v61 = vand.u32 2147483648, %v1014_v17  ;;  %vm1020_vm1 = vweird.f32 %v1014_v17  ;;  %v1024_v27 = vand.u32 2147483647, %v1014_v17 }
0x19a9   :  { %v1027_v30 = vor.u32 1.1754944e-38, %v1026_v61  ;;  %vm1025_vm3 = vcmp.eq.f32.partialorder %v1024_v27, 8.507059e+37 }
0x19ad   :  { %v1819_v21 = vpop.eup %1818 }
0x19ae   :  { %v1016_v24 = vmul.f32 %v1819_v21, %v1014_v17  ;;  %vm1021_vm15 = vweird.f32 %v1819_v21 }
0x19af   :  { %vm1022_vm2 = vmor %vm1020_vm1, %vm1021_vm15 }
0x19b0   :  { %v1017_v25 = vsub.f32 1.0, %v1016_v24 }
0x19b2   :  { %v1018_v26 = vmul.f32 %v1819_v21, %v1017_v25 }
0x19b4   :  { %v1019_v29 = vadd.f32 %v1819_v21, %v1018_v26 }
0x19b6   :  { %v1023_v19 = vsel %vm1022_vm2, %v1819_v21, %v1019_v29 }
0x19b7   :  { %v1028_v32 = vsel %vm1025_vm3, %v1027_v30, %v1023_v19 }
0x19b8   :  { %v1031_v1 = vmul.f32 %v1028_v32, %v2257_v55  ;;  %v1898_v55 = vld [vmem:[%s2502_s5 + $0x8] sm:$0xff] }
0x19fd   :  { %v1034_v58 = vpop.permute.xlu2 %1033 }
0x19fe   :  { %v1036_v33 = vmul.f32 %v1034_v58, %v1028_v32 }
0x1a00   :  { %1038 = vrot.lane.b32.xlu0 %v1036_v33, %s1903_s24 }
0x1a72   :  { %v1039_v43 = vpop.permute.xlu0 %1038 }
0x1a73   :  { %v2325_v34 = vadd.f32 %v1039_v43, %v1031_v1 }
0x1a75   :  { %1820 = vtanh.f32 %v2325_v34 }
0x1a7b   :  { %v1821_v3 = vpop.eup %1820 }
0x1a7c   :  { %1044 = vrot.lane.b32.xlu1 %v1821_v3, %s1902_s21 }
0x1aee   :  { %v1045_v41 = vpop.permute.xlu1 %1044 }
0x1aef   :  { %v2329_v36 = vmul.f32 %v1045_v41, %v1028_v32 }
0x1af1   :  { %v1048_v40 = vpack.c.bf16 %v2329_v36, %v2329_v36 }
0x1af3   :  { %1050 = vrot.lane.b32.xlu2 %v1048_v40, %s1903_s24 }
0x1b4d   :  { %v1051_v4 = vpop.permute.xlu2 %1050 }
0x1b4e   :  { %1680 = vmatmul.msk.bf16.vlgmr.msrb.gmra.mxu2 %vm94_vm0, %v1051_v4  ;;  %1681 = vmatmul.msk.bf16.vlgmr.msra.gmra.mxu3 %vm94_vm0, %v1051_v4 }
0x1b4f   :  { %1347 = vmatpush.bf16.msrb.mxu2 %v1898_v55  ;;  %1404 = vmatpush.bf16.msra.mxu3 %v2102_v22 }
0x1b53   :  { %1348 = vmatpush.bf16.msrb.mxu2 %v1899_v37  ;;  %1405 = vmatpush.bf16.msra.mxu3 %v2108_v23 }
0x1bd1   :  { %v2344_v45 = vpop.f32.mrf.mxu2  ;;  %v1077_v47 = vpop.f32.mrf.mxu3 }
0x1bd2   :  { %v1078_v48 = vadd.f32 %v1077_v47, %v2294_v38 }
0x1bd4   :  { %v1083_v49 = vadd.f32 %v1682_v39, %v1078_v48 }
0x1bd6   :  { %1822 = vtanh.f32 %v1083_v49  ;;  %v1683_v10 = vmul.f32 -1.442695, %v1083_v49 }
0x1bd8   :  { %1824 = vpow2.f32 %v1683_v10 }
0x1bd9   :  { %v1066_v54 = vpop.f32.mrf.mxu2  ;;  %v1079_v22 = vpop.f32.mrf.mxu3 }
0x1bdc   :  { %v1823_v20 = vpop.eup %1822 }
0x1bdd   :  { %1106 = vrot.lane.b32.xlu0 %v1823_v20, %s1902_s21 }
0x1bde   :  { %v1825_v46 = vpop.eup %1824 }
0x1bdf   :  { %v1087_v23 = vadd.f32 1.0, %v1825_v46 }
0x1be1   :  { %1826 = vrcp.f32 %v1087_v23  ;;  %v1099_v60 = vand.u32 2147483648, %v1087_v23  ;;  %vm1093_vm5 = vweird.f32 %v1087_v23  ;;  %v1097_v38 = vand.u32 2147483647, %v1087_v23 }
0x1be3   :  { %v1100_v6 = vor.u32 1.1754944e-38, %v1099_v60  ;;  %vm1098_vm7 = vcmp.eq.f32.partialorder %v1097_v38, 8.507059e+37 }
0x1be7   :  { %v1827_v51 = vpop.eup %1826 }
0x1be8   :  { %v1089_v35 = vmul.f32 %v1827_v51, %v1087_v23  ;;  %vm1094_vm4 = vweird.f32 %v1827_v51 }
0x1be9   :  { %vm1095_vm6 = vmor %vm1093_vm5, %vm1094_vm4 }
0x1bea   :  { %v1090_v53 = vsub.f32 1.0, %v1089_v35 }
0x1bec   :  { %v1091_v56 = vmul.f32 %v1827_v51, %v1090_v53 }
0x1bee   :  { %v1092_v57 = vadd.f32 %v1827_v51, %v1091_v56 }
0x1bf0   :  { %v1096_v63 = vsel %vm1095_vm6, %v1827_v51, %v1092_v57 }
0x1bf1   :  { %v1101_v28 = vsel %vm1098_vm7, %v1100_v6, %v1096_v63 }
0x1bf2   :  { %v1104_v18 = vmul.f32 %v1101_v28, %v2281_v52  ;;  %v2363_v52 = vld [vmem:[%s2503_s9] sm:$0xff] }
0x1bf3   :  { %v995_v14 = vadd.f32 %v2363_v52, %v2320_v2 }
0x1c4f   :  { %v1107_v8 = vpop.permute.xlu0 %1106 }
0x1c50   :  { %v1109_v31 = vmul.f32 %v1107_v8, %v1101_v28 }
0x1c52   :  { %1111 = vrot.lane.b32.xlu1 %v1109_v31, %s1903_s24 }
0x1cc4   :  { %v1112_v9 = vpop.permute.xlu1 %1111 }
0x1cc5   :  { %v2353_v42 = vadd.f32 %v1112_v9, %v1104_v18 }
0x1cc7   :  { %1828 = vtanh.f32 %v2353_v42 }
0x1ccd   :  { %v1829_v0 = vpop.eup %1828 }
0x1cce   :  { %1117 = vrot.lane.b32.xlu2 %v1829_v0, %s1902_s21 }
0x1d28   :  { %v1118_v44 = vpop.permute.xlu2 %1117 }
0x1d29   :  { %v1120_v11 = vmul.f32 %v1118_v44, %v1101_v28 }
0x1d2b   :  { %v1121_v12 = vpack.c.bf16 %v1120_v11, %v1120_v11 }
0x1d2d   :  { %1123 = vrot.lane.b32.xlu0 %v1121_v12, %s1903_s24 }
0x1d9f   :  { %v1124_v13 = vpop.permute.xlu0 %1123 }
0x1da0   :  { %1684 = vmatmul.msk.bf16.vlgmr.msrb.gmra.mxu0 %vm94_vm0, %v1124_v13  ;;  %1685 = vmatmul.msk.bf16.vlgmr.msra.gmra.mxu1 %vm94_vm0, %v1124_v13 }
0x1e1d   :  { %v2367_v15 = vpop.f32.mrf.mxu0  ;;  %v1150_v16 = vpop.f32.mrf.mxu1 }
0x1e1e   :  { %v1151_v50 = vadd.f32 %v1150_v16, %v995_v14 }
0x1e20   :  { %1830 = vtanh.f32 %v1151_v50  ;;  %v1686_v25 = vmul.f32 -1.442695, %v1151_v50 }
0x1e22   :  { %1832 = vpow2.f32 %v1686_v25 }
0x1e25   :  { %v1139_v17 = vpop.f32.mrf.mxu0  ;;  %v1152_v21 = vpop.f32.mrf.mxu1 }
0x1e26   :  { %v1831_v24 = vpop.eup %1830 }
0x1e27   :  { %1176 = vrot.lane.b32.xlu1 %v1831_v24, %s1902_s21  ;;  %v1692_v24 = vld [vmem:[%s2498_s0 + $0x28] sm:$0xff] }
0x1e28   :  { %v1833_v26 = vpop.eup %1832 }
0x1e29   :  { %v1157_v29 = vadd.f32 1.0, %v1833_v26 }
0x1e2b   :  { %1834 = vrcp.f32 %v1157_v29  ;;  %v1169_v58 = vand.u32 2147483648, %v1157_v29  ;;  %vm1163_vm9 = vweird.f32 %v1157_v29  ;;  %v1167_v32 = vand.u32 2147483647, %v1157_v29 }
0x1e2d   :  { %v1170_v1 = vor.u32 1.1754944e-38, %v1169_v58  ;;  %vm1168_vm11 = vcmp.eq.f32.partialorder %v1167_v32, 8.507059e+37 }
0x1e31   :  { %v1835_v61 = vpop.eup %1834 }
0x1e32   :  { %v1159_v27 = vmul.f32 %v1835_v61, %v1157_v29  ;;  %vm1164_vm8 = vweird.f32 %v1835_v61 }
0x1e33   :  { %vm1165_vm10 = vmor %vm1163_vm9, %vm1164_vm8 }
0x1e34   :  { %v1160_v19 = vsub.f32 1.0, %v1159_v27 }
0x1e36   :  { %v1161_v30 = vmul.f32 %v1835_v61, %v1160_v19 }
0x1e38   :  { %v1162_v2 = vadd.f32 %v1835_v61, %v1161_v30 }
0x1e3a   :  { %v1166_v33 = vsel %vm1165_vm10, %v1835_v61, %v1162_v2 }
0x1e3b   :  { %v1171_v3 = vsel %vm1168_vm11, %v1170_v1, %v1166_v33 }
0x1e3c   :  { %v1174_v40 = vmul.f32 %v1171_v3, %v2299_v62  ;;  %v2382_v62 = vld [vmem:[%s2505_s10] sm:$0xff] }
0x1e3d   :  { %v1065_v54 = vadd.f32 %v2382_v62, %v2344_v45 }
0x1e99   :  { %v1177_v43 = vpop.permute.xlu1 %1176 }
0x1e9a   :  { %v1179_v41 = vmul.f32 %v1177_v43, %v1171_v3 }
0x1e9c   :  { %1181 = vrot.lane.b32.xlu2 %v1179_v41, %s1903_s24 }
0x1ef6   :  { %v1182_v4 = vpop.permute.xlu2 %1181 }
0x1ef7   :  { %v2372_v55 = vadd.f32 %v1182_v4, %v1174_v40 }
0x1ef9   :  { %1836 = vtanh.f32 %v2372_v55 }
0x1eff   :  { %v1837_v37 = vpop.eup %1836 }
0x1f00   :  { %1187 = vrot.lane.b32.xlu0 %v1837_v37, %s1902_s21 }
0x1f72   :  { %v1188_v47 = vpop.permute.xlu0 %1187 }
0x1f73   :  { %v1190_v39 = vmul.f32 %v1188_v47, %v1171_v3 }
0x1f75   :  { %v1191_v48 = vpack.c.bf16 %v1190_v39, %v1190_v39 }
0x1f77   :  { %1193 = vrot.lane.b32.xlu1 %v1191_v48, %s1903_s24 }
0x1fe9   :  { %v1194_v49 = vpop.permute.xlu1 %1193 }
0x1fea   :  { %1687 = vmatmul.msk.bf16.vlgmr.msra.gmra.mxu2 %vm94_vm0, %v1194_v49  ;;  %1688 = vmatmul.msk.bf16.vlgmr.msrb.gmra.mxu3 %vm94_vm0, %v1194_v49 }
0x206d   :  { %v2386_v22 = vpop.f32.mrf.mxu2  ;;  %v1220_v20 = vpop.f32.mrf.mxu3 }
0x206e   :  { %v1221_v10 = vadd.f32 %v1220_v20, %v1065_v54 }
0x2070   :  { %1838 = vtanh.f32 %v1221_v10  ;;  %v1689_v35 = vmul.f32 -1.442695, %v1221_v10 }
0x2072   :  { %1840 = vpow2.f32 %v1689_v35 }
0x2075   :  { %v1209_v46 = vpop.f32.mrf.mxu2  ;;  %v1222_v23 = vpop.f32.mrf.mxu3 }
0x2076   :  { %v1839_v51 = vpop.eup %1838 }
0x2077   :  { %1246 = vrot.lane.b32.xlu2 %v1839_v51, %s1902_s21  ;;  %v1208_v51 = vadd.f32 %v2363_v52, %v2386_v22 }
0x2078   :  { %v1841_v53 = vpop.eup %1840 }
0x2079   :  { %v1227_v56 = vadd.f32 1.0, %v1841_v53 }
0x207b   :  { %1842 = vrcp.f32 %v1227_v56  ;;  %v1239_v6 = vand.u32 2147483648, %v1227_v56  ;;  %vm1233_vm13 = vweird.f32 %v1227_v56  ;;  %v1237_v8 = vand.u32 2147483647, %v1227_v56 }
0x207d   :  { %v1240_v31 = vor.u32 1.1754944e-38, %v1239_v6  ;;  %vm1238_vm15 = vcmp.eq.f32.partialorder %v1237_v8, 8.507059e+37 }
0x2081   :  { %v1843_v57 = vpop.eup %1842 }
0x2082   :  { %v1229_v60 = vmul.f32 %v1843_v57, %v1227_v56  ;;  %vm1234_vm12 = vweird.f32 %v1843_v57 }
0x2083   :  { %vm1235_vm14 = vmor %vm1233_vm13, %vm1234_vm12 }
0x2084   :  { %v1230_v38 = vsub.f32 1.0, %v1229_v60 }
0x2086   :  { %v1231_v63 = vmul.f32 %v1843_v57, %v1230_v38 }
0x2088   :  { %v1232_v45 = vadd.f32 %v1843_v57, %v1231_v63 }
0x208a   :  { %v1236_v28 = vsel %vm1235_vm14, %v1843_v57, %v1232_v45  ;;  %vm1576_vm14 = vcmask 31744  }
0x208b   :  { %v1241_v9 = vsel %vm1238_vm15, %v1240_v31, %v1236_v28 }
0x208c   :  { %v1244_v44 = vmul.f32 %v1241_v9, %v2325_v34 }
0x20d1   :  { %v1247_v18 = vpop.permute.xlu2 %1246 }
0x20d2   :  { %v1249_v0 = vmul.f32 %v1247_v18, %v1241_v9 }
0x20d4   :  { %1251 = vrot.lane.b32.xlu0 %v1249_v0, %s1903_s24 }
0x2146   :  { %v1252_v11 = vpop.permute.xlu0 %1251 }
0x2147   :  { %v2391_v12 = vadd.f32 %v1252_v11, %v1244_v44 }
0x2149   :  { %1844 = vtanh.f32 %v2391_v12 }
0x214f   :  { %v1845_v13 = vpop.eup %1844 }
0x2150   :  { %1257 = vrot.lane.b32.xlu1 %v1845_v13, %s1902_s21 }
0x21c2   :  { %v1258_v14 = vpop.permute.xlu1 %1257 }
0x21c3   :  { %v2395_v16 = vmul.f32 %v1258_v14, %v1241_v9 }
0x21c5   :  { %v1261_v50 = vpack.c.bf16 %v2395_v16, %v2395_v16 }
0x21c7   :  { %1263 = vrot.lane.b32.xlu2 %v1261_v50, %s1903_s24 }
0x2221   :  { %v1264_v17 = vpop.permute.xlu2 %1263 }
0x2222   :  { %1690 = vmatmul.msk.bf16.vlgmr.msra.gmra.mxu0 %vm94_vm0, %v1264_v17  ;;  %1691 = vmatmul.msk.bf16.vlgmr.msrb.gmra.mxu1 %vm94_vm0, %v1264_v17 }
0x229f   :  { %v2402_v34 = vpop.f32.mrf.mxu0  ;;  %v1290_v21 = vpop.f32.mrf.mxu1 }
0x22a0   :  { %v1291_v25 = vadd.f32 %v1290_v21, %v2367_v15 }
0x22a2   :  { %v1296_v26 = vadd.f32 %v1692_v24, %v1291_v25 }
0x22a4   :  { %1846 = vtanh.f32 %v1296_v26  ;;  %v1693_v19 = vmul.f32 -1.442695, %v1296_v26  ;;  %v1278_v26 = vadd.f32 %v2382_v62, %v2402_v34  ;;  %v1722_v62 = vld [vmem:[%s2506_s11 + $0x8] sm:$0xff]  ;;  %v1721_v34 = vld [vmem:[%s2506_s11] sm:$0xff] }
0x22a5   :  { %1495 = vmatpush.bf16.msrb.mxu0 %v1722_v62 }
0x22a6   :  { %1848 = vpow2.f32 %v1693_v19  ;;  %v1448_v19 = vpack.c.bf16 %v2201_v5, %v2141_v7 }
0x22a7   :  { %v1279_v29 = vpop.f32.mrf.mxu0  ;;  %v1292_v61 = vpop.f32.mrf.mxu1 }
0x22a9   :  { %1496 = vmatpush.bf16.msrb.mxu0 %v1721_v34 }
0x22aa   :  { %v1847_v27 = vpop.eup %1846 }
0x22ab   :  { %1319 = vrot.lane.b32.xlu0 %v1847_v27, %s1902_s21 }
0x22ac   :  { %v1849_v30 = vpop.eup %1848 }
0x22ad   :  { %v1300_v2 = vadd.f32 1.0, %v1849_v30 }
0x22af   :  { %1850 = vrcp.f32 %v1300_v2  ;;  %v1312_v3 = vand.u32 2147483648, %v1300_v2  ;;  %vm1306_vm2 = vweird.f32 %v1300_v2  ;;  %v1310_v15 = vand.u32 2147483647, %v1300_v2 }
0x22b1   :  { %v1313_v40 = vor.u32 1.1754944e-38, %v1312_v3  ;;  %vm1311_vm4 = vcmp.eq.f32.partialorder %v1310_v15, 8.507059e+37 }
0x22b5   :  { %v1851_v58 = vpop.eup %1850 }
0x22b6   :  { %v1302_v32 = vmul.f32 %v1851_v58, %v1300_v2  ;;  %vm1307_vm1 = vweird.f32 %v1851_v58 }
0x22b7   :  { %vm1308_vm3 = vmor %vm1306_vm2, %vm1307_vm1 }
0x22b8   :  { %v1303_v33 = vsub.f32 1.0, %v1302_v32 }
0x22ba   :  { %v1304_v1 = vmul.f32 %v1851_v58, %v1303_v33 }
0x22bc   :  { %v1305_v43 = vadd.f32 %v1851_v58, %v1304_v1 }
0x22be   :  { %v1309_v41 = vsel %vm1308_vm3, %v1851_v58, %v1305_v43 }
0x22bf   :  { %v1314_v37 = vsel %vm1311_vm4, %v1313_v40, %v1309_v41 }
0x22c0   :  { %v1317_v39 = vmul.f32 %v1314_v37, %v2353_v42 }
0x231d   :  { %v1320_v4 = vpop.permute.xlu0 %1319 }
0x231e   :  { %v1322_v47 = vmul.f32 %v1320_v4, %v1314_v37 }
0x2320   :  { %1324 = vrot.lane.b32.xlu1 %v1322_v47, %s1903_s24 }
0x2392   :  { %v1325_v48 = vpop.permute.xlu1 %1324 }
0x2393   :  { %v1327_v49 = vadd.f32 %v1325_v48, %v1317_v39  ;;  %v1449_v39 = vpack.c.bf16 %v2329_v36, %v2261_v59 }
0x2395   :  { %1852 = vtanh.f32 %v1327_v49 }
0x239b   :  { %v1853_v54 = vpop.eup %1852 }
0x239c   :  { %1330 = vrot.lane.b32.xlu2 %v1853_v54, %s1902_s21 }
0x23f6   :  { %v1331_v20 = vpop.permute.xlu2 %1330 }
0x23f7   :  { %v1333_v10 = vmul.f32 %v1331_v20, %v1314_v37 }
0x23f9   :  { %v1334_v46 = vpack.c.bf16 %v1333_v10, %v1333_v10 }
0x23fb   :  { %1336 = vrot.lane.b32.xlu0 %v1334_v46, %s1903_s24  ;;  %v2445_v46 = vld [vmem:[%s2507_s12] ss:$0 sm:$0xff] }
0x246d   :  { %v1337_v23 = vpop.permute.xlu0 %1336 }
0x246e   :  { %1694 = vmatmul.msk.bf16.vlgmr.msrb.gmra.mxu2 %vm94_vm0, %v1337_v23 }
0x24f1   :  { %v1350_v35 = vpop.f32.mrf.mxu2 }
0x24f2   :  { %v1351_v53 = vadd.f32 %v1350_v35, %v1208_v51 }
0x24f4   :  { %1854 = vtanh.f32 %v1351_v53  ;;  %v1695_v57 = vmul.f32 -1.442695, %v1351_v53 }
0x24f6   :  { %1856 = vpow2.f32 %v1695_v57 }
0x24f9   :  { %v1352_v42 = vpop.f32.mrf.mxu2 }
0x24fa   :  { %v1855_v56 = vpop.eup %1854 }
0x24fb   :  { %1376 = vrot.lane.b32.xlu1 %v1855_v56, %s1902_s21 }
0x24fc   :  { %v1857_v60 = vpop.eup %1856 }
0x24fd   :  { %v1357_v38 = vadd.f32 1.0, %v1857_v60 }
0x24ff   :  { %1858 = vrcp.f32 %v1357_v38  ;;  %v1369_v31 = vand.u32 2147483648, %v1357_v38  ;;  %vm1363_vm6 = vweird.f32 %v1357_v38  ;;  %v1367_v52 = vand.u32 2147483647, %v1357_v38 }
0x2501   :  { %v1370_v18 = vor.u32 1.1754944e-38, %v1369_v31  ;;  %vm1368_vm8 = vcmp.eq.f32.partialorder %v1367_v52, 8.507059e+37 }
0x2505   :  { %v1859_v63 = vpop.eup %1858 }
0x2506   :  { %v1359_v45 = vmul.f32 %v1859_v63, %v1357_v38  ;;  %vm1364_vm5 = vweird.f32 %v1859_v63 }
0x2507   :  { %vm1365_vm7 = vmor %vm1363_vm6, %vm1364_vm5 }
0x2508   :  { %v1360_v6 = vsub.f32 1.0, %v1359_v45 }
0x250a   :  { %v1361_v8 = vmul.f32 %v1859_v63, %v1360_v6 }
0x250c   :  { %v1362_v28 = vadd.f32 %v1859_v63, %v1361_v8 }
0x250e   :  { %v1366_v22 = vsel %vm1365_vm7, %v1859_v63, %v1362_v28  ;;  %v1513_v63 = vlaneseq }
0x250f   :  { %v1371_v0 = vsel %vm1368_vm8, %v1370_v18, %v1366_v22 }
0x2510   :  { %v1374_v11 = vmul.f32 %v1371_v0, %v2372_v55  ;;  %v2449_v45 = vand.u32 127, %v1513_v63 }
0x2512   :  { %vm1569_vm13 = vcmp.ge.s32.totalorder %v2449_v45, 2 }
0x256d   :  { %v1377_v9 = vpop.permute.xlu1 %1376 }
0x256e   :  { %v1379_v44 = vmul.f32 %v1377_v9, %v1371_v0 }
0x2570   :  { %1381 = vrot.lane.b32.xlu2 %v1379_v44, %s1903_s24 }
0x25ca   :  { %v1382_v13 = vpop.permute.xlu2 %1381 }
0x25cb   :  { %v1384_v14 = vadd.f32 %v1382_v13, %v1374_v11 }
0x25cd   :  { %1860 = vtanh.f32 %v1384_v14 }
0x25d3   :  { %v1861_v50 = vpop.eup %1860 }
0x25d4   :  { %1387 = vrot.lane.b32.xlu0 %v1861_v50, %s1902_s21 }
0x2646   :  { %v1388_v17 = vpop.permute.xlu0 %1387 }
0x2647   :  { %v1390_v21 = vmul.f32 %v1388_v17, %v1371_v0 }
0x2649   :  { %v1391_v24 = vpack.c.bf16 %v1390_v21, %v1390_v21 }
0x264b   :  { %1393 = vrot.lane.b32.xlu1 %v1391_v24, %s1903_s24 }
0x26bd   :  { %v1394_v25 = vpop.permute.xlu1 %1393 }
0x26be   :  { %1696 = vmatmul.msk.bf16.vlgmr.msra.gmra.mxu3 %vm94_vm0, %v1394_v25 }
0x2741   :  { %v1407_v29 = vpop.f32.mrf.mxu3 }
0x2742   :  { %v1408_v61 = vadd.f32 %v1407_v29, %v1278_v26 }
0x2744   :  { %1862 = vtanh.f32 %v1408_v61  ;;  %v1697_v30 = vmul.f32 -1.442695, %v1408_v61 }
0x2746   :  { %1864 = vpow2.f32 %v1697_v30 }
0x2749   :  { %v1409_v55 = vpop.f32.mrf.mxu3 }
0x274a   :  { %v1863_v27 = vpop.eup %1862 }
0x274b   :  { %1433 = vrot.lane.b32.xlu2 %v1863_v27, %s1902_s21 }
0x274c   :  { %v1865_v2 = vpop.eup %1864 }
0x274d   :  { %v1414_v58 = vadd.f32 1.0, %v1865_v2 }
0x274f   :  { %1866 = vrcp.f32 %v1414_v58  ;;  %v1426_v43 = vand.u32 2147483648, %v1414_v58  ;;  %vm1420_vm10 = vweird.f32 %v1414_v58  ;;  %v1424_v3 = vand.u32 2147483647, %v1414_v58 }
0x2751   :  { %v1427_v41 = vor.u32 1.1754944e-38, %v1426_v43  ;;  %vm1425_vm12 = vcmp.eq.f32.partialorder %v1424_v3, 8.507059e+37 }
0x2753   :  { %1462 = vrot.lane.b32.xlu2 %v1448_v19, %s1903_s24 }
0x2755   :  { %v1867_v32 = vpop.eup %1866 }
0x2756   :  { %v1416_v33 = vmul.f32 %v1867_v32, %v1414_v58  ;;  %vm1421_vm9 = vweird.f32 %v1867_v32 }
0x2757   :  { %vm1422_vm11 = vmor %vm1420_vm10, %vm1421_vm9 }
0x2758   :  { %v1417_v7 = vsub.f32 1.0, %v1416_v33 }
0x275a   :  { %v1418_v5 = vmul.f32 %v1867_v32, %v1417_v7 }
0x275c   :  { %v1419_v1 = vadd.f32 %v1867_v32, %v1418_v5 }
0x275e   :  { %v1423_v15 = vsel %vm1422_vm11, %v1867_v32, %v1419_v1 }
0x275f   :  { %v1428_v4 = vsel %vm1425_vm12, %v1427_v41, %v1423_v15 }
0x2760   :  { %v1431_v48 = vmul.f32 %v1428_v4, %v2391_v12 }
0x27a5   :  { %v1434_v40 = vpop.permute.xlu2 %1433 }
0x27a6   :  { %v1436_v37 = vmul.f32 %v1434_v40, %v1428_v4 }
0x27a8   :  { %1438 = vrot.lane.b32.xlu0 %v1436_v37, %s1903_s24 }
0x27ad   :  { %v1463_v47 = vpop.permute.xlu2 %1462 }
0x27ae   :  { %1706 = vmatmul.msk.bf16.vlgmr.msrb.gmra.mxu0 %vm94_vm0, %v1463_v47 }
0x27b0   :  { %1464 = vrot.lane.b32.xlu0 %v1449_v39, %s1903_s24 }
0x281a   :  { %v1439_v49 = vpop.permute.xlu0 %1438 }
0x281b   :  { %v1441_v54 = vadd.f32 %v1439_v49, %v1431_v48 }
0x281d   :  { %1868 = vtanh.f32 %v1441_v54 }
0x2822   :  { %v1465_v20 = vpop.permute.xlu0 %1464 }
0x2823   :  { %v1869_v10 = vpop.eup %1868  ;;  %1707 = vmatmul.msk.bf16.gmra.mxu0 %vm94_vm0, %v1465_v20 }
0x2824   :  { %1444 = vrot.lane.b32.xlu1 %v1869_v10, %s1902_s21 }
0x282b   :  { %v1498_v59 = vpop.f32.mrf.mxu0 }
0x282c   :  { %v1499_v36 = vadd.f32 %v2445_v46, %v1498_v59 }
0x282e   :  { %v1521_v23 = vand.u32 2147483647, %v1499_v36  ;;  %v1515_v31 = vmax.f32 %v1499_v36, 0.0 }
0x2830   :  { %v1527_v51 = vsub.f32 0.0, %v1521_v23 }
0x2832   :  { %v1533_v12 = vmul.f32 1.442695, %v1527_v51 }
0x2833   :  { %v1500_v35 = vpop.f32.mrf.mxu0 }
0x2834   :  { %1870 = vpow2.f32 %v1533_v12  ;;  %v1501_v53 = vadd.f32 %v2445_v46, %v1500_v35 }
0x2836   :  { %v1522_v42 = vand.u32 2147483647, %v1501_v53  ;;  %v1516_v0 = vmax.f32 %v1501_v53, 0.0 }
0x2838   :  { %v1528_v56 = vsub.f32 0.0, %v1522_v42 }
0x283a   :  { %v1871_v57 = vpop.eup %1870  ;;  %v1535_v60 = vmul.f32 1.442695, %v1528_v56 }
0x283b   :  { %v1545_v38 = vadd.f32 1.0, %v1871_v57 }
0x283c   :  { %1872 = vpow2.f32 %v1535_v60 }
0x283d   :  { %1874 = vlog2.f32 %v1545_v38 }
0x2842   :  { %v1873_v6 = vpop.eup %1872 }
0x2843   :  { %v1875_v8 = vpop.eup %1874  ;;  %v1546_v28 = vadd.f32 1.0, %v1873_v6 }
0x2844   :  { %v1552_v52 = vmul.f32 0.6931472, %v1875_v8 }
0x2845   :  { %1876 = vlog2.f32 %v1546_v28 }
0x2846   :  { %v1563_v22 = vadd.f32 %v1552_v52, %v1515_v31 }
0x2848   :  { %v1570_v18 = vsel %vm1569_vm13, %v1563_v22, %v1499_v36 }
0x2849   :  { %1577 = vst.msk [vmem:[%s2508_s13] sm:$0xff] %vm1576_vm14, %v1570_v18 }
0x284b   :  { %v1877_v9 = vpop.eup %1876 }
0x284c   :  { %v1554_v44 = vmul.f32 0.6931472, %v1877_v9 }
0x284e   :  { %v1564_v11 = vadd.f32 %v1554_v44, %v1516_v0 }
0x2850   :  { %v1571_v13 = vsel %vm1569_vm13, %v1564_v11, %v1501_v53 }
0x2851   :  { %1578 = vst.msk [vmem:[%s2508_s13 + $0x8] sm:$0xff] %vm1576_vm14, %v1571_v13 }
0x2896   :  { %v1445_v14 = vpop.permute.xlu1 %1444 }
0x2897   :  { %v1447_v50 = vmul.f32 %v1445_v14, %v1428_v4 }
0x2899   :  { %v1450_v17 = vpack.c.bf16 %v1447_v50, %v2395_v16 }
0x289b   :  { %1466 = vrot.lane.b32.xlu1 %v1450_v17, %s1903_s24 }
0x28a0   :  { %v1503_v21 = vpop.f32.mrf.mxu0 }
0x28a1   :  { %v1504_v24 = vadd.f32 %v2445_v46, %v1503_v21 }
0x28a3   :  { %v1523_v25 = vand.u32 2147483647, %v1504_v24  ;;  %v1517_v32 = vmax.f32 %v1504_v24, 0.0 }
0x28a5   :  { %v1529_v26 = vsub.f32 0.0, %v1523_v25 }
0x28a7   :  { %v1537_v29 = vmul.f32 1.442695, %v1529_v26 }
0x28a8   :  { %v1505_v61 = vpop.f32.mrf.mxu0 }
0x28a9   :  { %1878 = vpow2.f32 %v1537_v29  ;;  %v1506_v55 = vadd.f32 %v2445_v46, %v1505_v61 }
0x28ab   :  { %v1524_v27 = vand.u32 2147483647, %v1506_v55  ;;  %v1518_v43 = vmax.f32 %v1506_v55, 0.0 }
0x28ad   :  { %v1530_v19 = vsub.f32 0.0, %v1524_v27 }
0x28af   :  { %v1879_v30 = vpop.eup %1878  ;;  %v1539_v2 = vmul.f32 1.442695, %v1530_v19 }
0x28b0   :  { %v1547_v58 = vadd.f32 1.0, %v1879_v30 }
0x28b1   :  { %1880 = vpow2.f32 %v1539_v2 }
0x28b2   :  { %1882 = vlog2.f32 %v1547_v58 }
0x28b7   :  { %v1881_v16 = vpop.eup %1880 }
0x28b8   :  { %v1883_v62 = vpop.eup %1882  ;;  %v1548_v34 = vadd.f32 1.0, %v1881_v16 }
0x28b9   :  { %v1556_v33 = vmul.f32 0.6931472, %v1883_v62 }
0x28ba   :  { %1884 = vlog2.f32 %v1548_v34 }
0x28bb   :  { %v1565_v7 = vadd.f32 %v1556_v33, %v1517_v32 }
0x28bd   :  { %v1572_v5 = vsel %vm1569_vm13, %v1565_v7, %v1504_v24 }
0x28be   :  { %1579 = vst.msk [vmem:[%s2508_s13 + $0x10] sm:$0xff] %vm1576_vm14, %v1572_v5 }
0x28c0   :  { %v1885_v1 = vpop.eup %1884 }
0x28c1   :  { %v1558_v3 = vmul.f32 0.6931472, %v1885_v1 }
0x28c3   :  { %v1566_v15 = vadd.f32 %v1558_v3, %v1518_v43 }
0x28c5   :  { %v1573_v41 = vsel %vm1569_vm13, %v1566_v15, %v1506_v55 }
0x28c6   :  { %1580 = vst.msk [vmem:[%s2508_s13 + $0x18] sm:$0xff] %vm1576_vm14, %v1573_v41 }
0x290d   :  { %v1467_v40 = vpop.permute.xlu1 %1466 }
0x290e   :  { %1708 = vmatmul.msk.bf16.gmra.mxu0 %vm94_vm0, %v1467_v40 }
0x298b   :  { %v1508_v4 = vpop.f32.mrf.mxu0 }
0x298c   :  { %v1509_v37 = vadd.f32 %v2445_v46, %v1508_v4 }
0x298e   :  { %v1525_v47 = vand.u32 2147483647, %v1509_v37  ;;  %v1519_v53 = vmax.f32 %v1509_v37, 0.0 }
0x2990   :  { %v1531_v39 = vsub.f32 0.0, %v1525_v47 }
0x2992   :  { %v1541_v48 = vmul.f32 1.442695, %v1531_v39 }
0x2993   :  { %v1510_v49 = vpop.f32.mrf.mxu0 }
0x2994   :  { %1886 = vpow2.f32 %v1541_v48  ;;  %v1511_v54 = vadd.f32 %v2445_v46, %v1510_v49 }
0x2996   :  { %v1526_v20 = vand.u32 2147483647, %v1511_v54  ;;  %v1520_v60 = vmax.f32 %v1511_v54, 0.0 }
0x2998   :  { %v1532_v10 = vsub.f32 0.0, %v1526_v20 }
0x299a   :  { %v1887_v59 = vpop.eup %1886  ;;  %v1543_v36 = vmul.f32 1.442695, %v1532_v10 }
0x299b   :  { %v1549_v23 = vadd.f32 1.0, %v1887_v59 }
0x299c   :  { %1888 = vpow2.f32 %v1543_v36 }
0x299d   :  { %1890 = vlog2.f32 %v1549_v23 }
0x29a2   :  { %v1889_v51 = vpop.eup %1888 }
0x29a3   :  { %v1891_v12 = vpop.eup %1890  ;;  %v1550_v35 = vadd.f32 1.0, %v1889_v51 }
0x29a4   :  { %v1560_v42 = vmul.f32 0.6931472, %v1891_v12 }
0x29a5   :  { %1892 = vlog2.f32 %v1550_v35 }
0x29a6   :  { %v1567_v56 = vadd.f32 %v1560_v42, %v1519_v53 }
0x29a8   :  { %v1574_v57 = vsel %vm1569_vm13, %v1567_v56, %v1509_v37 }
0x29a9   :  { %1581 = vst.msk [vmem:[%s2508_s13 + $0x20] sm:$0xff] %vm1576_vm14, %v1574_v57 }
0x29ab   :  { %v1893_v46 = vpop.eup %1892 }
0x29ac   :  { %v1562_v38 = vmul.f32 0.6931472, %v1893_v46 }
0x29ae   :  { %v1568_v63 = vadd.f32 %v1562_v38, %v1520_v60 }
0x29b0   :  { %v1575_v6 = vsel %vm1569_vm13, %v1568_v63, %v1511_v54 }
0x29b1   :  { %1582 = vst.msk [vmem:[%s2508_s13 + $0x28] sm:$0xff] %vm1576_vm14, %v1575_v6 }

</bundles_post_ra>
